<compile_context>
chip_gen: v7x
topology: tpu7x:2x2x1
jax: 0.10.0
libtpu: 0.0.40
codegen_flags: <defaults>
</compile_context>

<pallas_src>
import functools

import jax
import jax.numpy as jnp
from jax import lax
from jax.experimental import pallas as pl
from jax.experimental.pallas import tpu as pltpu

C_IN = 4     # input channels
C1 = 32      # conv1 output channels (kept at true width in the VMEM scratch)
C2 = 64      # conv2 output channels (= encoder feature dim)
C_PAD = 128  # lane-dense padding for the conv2 / output channel axis


# ----------------------------------------------------------------------------
# Fused Pallas kernel: conv1 + ReLU -> conv2 + ReLU -> global average pool
# ----------------------------------------------------------------------------
def _encoder_kernel(p_ref, w1_ref, b1_ref, mask_ref, w2_ref, b2_ref, pw_ref,
                    o_ref, act1_ref, *, tap_offsets, m2):
    """One grid step processes `I` images stacked along the row axis.

    p_ref   : (M1, 36)    bf16  conv1 im2col patches, padded row layout
    w1_ref  : (36, C1)    bf16  conv1 weights, taps packed along K
    b1_ref  : (1, C1)     f32
    mask_ref: (M1, 1)     f32   1 on interior rows, 0 on halo/headroom rows
    w2_ref  : (9*C1, CP)  bf16  conv2 weights, taps packed along K
    b2_ref  : (1, CP)     f32
    pw_ref  : (I, M2)     f32   pooling weights (stride-2 mask * 1/(Ho*Wo))
    o_ref   : (I, CP)     f32   pooled features
    act1_ref: (M1, C1)    bf16  VMEM scratch holding the conv1 activation
    """
    # ---- conv1: single K=36 matmul (all 9 taps pre-packed along K) + ReLU.
    acc1 = jnp.dot(p_ref[...], w1_ref[...], preferred_element_type=jnp.float32)
    act1 = jnp.maximum(acc1 + b1_ref[...], 0.0)
    # Halo / headroom rows see a zero patch, so they would otherwise carry
    # ReLU(b1); zero them explicitly (jnp.where, no 0*x masking hazard).
    act1 = jnp.where(mask_ref[...] > 0.5, act1, 0.0)
    act1_ref[...] = act1.astype(jnp.bfloat16)

    # ---- conv2: lane-concatenate the 9 shifted views of the scratch into one
    # (M2, 9*C1) lhs and contract in a single K=288 matmul.
    lhs2 = jnp.concatenate(
        [act1_ref[pl.ds(off, m2), :] for off in tap_offsets], axis=-1)
    acc2 = jnp.dot(lhs2, w2_ref[...], preferred_element_type=jnp.float32)
    act2 = jnp.maximum(acc2 + b2_ref[...], 0.0)            # (M2, CP) f32

    # ---- fused global average pool on the MXU.  Pool weights are exactly 0
    # on junk / stride-skipped rows (whose activations are finite), so they
    # contribute nothing.
    o_ref[...] = lax.dot_general(pw_ref[...], act2,
                                 (((1,), (0,)), ((), ())),
                                 preferred_element_type=jnp.float32)


def encoder_pallas(patches, w1p, b1p, mask, w2p, b2p, poolw, *, wp):
    """pallas_call wrapper.  patches: (G, M1, 36) bf16; returns (G, I, CP) f32."""
    g, m1, k1 = patches.shape
    c1 = w1p.shape[1]
    k2, cp = w2p.shape
    i, m2 = poolw.shape
    tap_offsets = tuple(dy * wp + dx for dy in range(3) for dx in range(3))

    kernel = functools.partial(_encoder_kernel, tap_offsets=tap_offsets, m2=m2)

    flops = 2 * g * (m1 * k1 * c1 + m2 * k2 * cp + i * m2 * cp)
    bytes_accessed = (2 * g * m1 * k1           # patches (bf16)
                      + 2 * k1 * c1 + 4 * c1    # w1 + b1
                      + 4 * m1                  # interior mask
                      + 2 * k2 * cp + 4 * cp    # w2 + b2
                      + 4 * i * m2              # pool weights
                      + 4 * g * i * cp)         # pooled output

    return pl.pallas_call(
        kernel,
        out_shape=jax.ShapeDtypeStruct((g, i, cp), jnp.float32),
        grid_spec=pltpu.PrefetchScalarGridSpec(
            num_scalar_prefetch=0,
            grid=(g,),
            in_specs=[
                pl.BlockSpec((None, m1, k1), lambda n: (n, 0, 0)),
                pl.BlockSpec((k1, c1), lambda n: (0, 0)),
                pl.BlockSpec((1, c1), lambda n: (0, 0)),
                pl.BlockSpec((m1, 1), lambda n: (0, 0)),
                pl.BlockSpec((k2, cp), lambda n: (0, 0)),
                pl.BlockSpec((1, cp), lambda n: (0, 0)),
                pl.BlockSpec((i, m2), lambda n: (0, 0)),
            ],
            out_specs=pl.BlockSpec((None, i, cp), lambda n: (n, 0, 0)),
            scratch_shapes=[pltpu.VMEM((m1, c1), jnp.bfloat16)],
        ),
        compiler_params=pltpu.CompilerParams(
            dimension_semantics=("parallel",),   # shard images over v7x's 2 TCs
            vmem_limit_bytes=32 * 1024 * 1024,
        ),
        cost_estimate=pl.CostEstimate(flops=flops, transcendentals=0,
                                      bytes_accessed=bytes_accessed),
    )(patches, w1p, b1p, mask, w2p, b2p, poolw)


# ----------------------------------------------------------------------------
# Parameters (synthetic, deterministic) and MXU-friendly packing
# ----------------------------------------------------------------------------
def init_params(cin=C_IN, c1=C1, c2=C2, key=None):
    """Deterministic synthetic f32 HWIO weights standing in for the timm backbone."""
    if key is None:
        key = jax.random.PRNGKey(0)
    k1, k2, k3, k4 = jax.random.split(key, 4)
    return dict(
        w1=jax.random.normal(k1, (3, 3, cin, c1), jnp.float32) * 0.05,
        b1=jax.random.normal(k2, (c1,), jnp.float32) * 0.01,
        w2=jax.random.normal(k3, (3, 3, c1, c2), jnp.float32) * 0.05,
        b2=jax.random.normal(k4, (c2,), jnp.float32) * 0.01,
    )


def pack_params(raw, cout_pad=C_PAD):
    """Pack f32 HWIO weights into the tap-along-K layouts the kernel uses.

    Real PyTorch/timm weights (Cout, Cin, kh, kw) should be permuted with
    w.transpose(2, 3, 1, 0) to HWIO before packing.
    """
    w1, w2 = raw["w1"], raw["w2"]
    kh, kw, cin, c1 = w1.shape
    c2 = w2.shape[-1]
    w1p = w1.reshape(kh * kw * cin, c1).astype(jnp.bfloat16)          # (36, 32)
    w2p = jnp.pad(w2.reshape(kh * kw * c1, c2),
                  ((0, 0), (0, cout_pad - c2))).astype(jnp.bfloat16)  # (288, 128)
    b1p = raw["b1"].reshape(1, c1).astype(jnp.float32)
    b2p = jnp.pad(raw["b2"], (0, cout_pad - c2)).reshape(1, cout_pad)
    return dict(w1=w1p, b1=b1p, w2=w2p, b2=b2p.astype(jnp.float32))


# ----------------------------------------------------------------------------
# Forward
# ----------------------------------------------------------------------------
@functools.partial(jax.jit, static_argnames=("imgs_per_step",))
def image_encoder_forward(params, x_nchw, imgs_per_step=1):
    """x_nchw: (B, Cin, H, W) f32  ->  (B, C2) f32 pooled features."""
    x = jnp.transpose(x_nchw, (0, 2, 3, 1))              # NHWC f32
    b, h, w, cin = x.shape
    hp, wp = h + 3, w + 2                                 # 1-px halo + headroom row
    r_img = hp * wp                                       # padded rows per image
    rows2 = h * wp                                        # conv2 stride-1 rows/img
    ho2, wo2 = (h - 1) // 2 + 1, (w - 1) // 2 + 1

    i = imgs_per_step
    g = -(-b // i)
    bp = g * i
    if bp != b:                                           # pad batch to a multiple of I
        x = jnp.concatenate([x, jnp.zeros((bp - b, h, w, cin), x.dtype)], axis=0)

    # conv1 im2col (tiny at Cin=4), laid out directly in the padded,
    # row-flattened order the in-kernel conv2 expects.
    xpad = jnp.pad(x, ((0, 0), (1, 1), (1, 1), (0, 0)))
    taps = [xpad[:, dy:dy + h, dx:dx + w, :] for dy in range(3) for dx in range(3)]
    patches = jnp.concatenate(taps, axis=-1)              # (Bp, H, W, 36)
    patches = jnp.pad(patches, ((0, 0), (1, 2), (1, 1), (0, 0)))  # zero halo rows
    patches = patches.reshape(g, i * r_img, 9 * cin).astype(jnp.bfloat16)

    # Interior-row mask: 1 where a real conv1 output lives, 0 on the halo.
    rr = jnp.arange(r_img)
    yp, xp = rr // wp, rr % wp
    interior = (yp >= 1) & (yp <= h) & (xp >= 1) & (xp <= w)
    mask = jnp.tile(interior.astype(jnp.float32)[:, None], (i, 1))   # (I*R_IMG, 1)

    # Pool weights: stride-2 sub-grid + junk-column mask + 1/(Ho*Wo), laid out
    # block-diagonally over the I images stacked in one grid step.
    r2 = jnp.arange(rows2)
    y2, x2 = r2 // wp, r2 % wp
    keep = (y2 % 2 == 0) & (x2 % 2 == 0) & (x2 < w)
    pw_row = jnp.where(keep, 1.0 / (ho2 * wo2), 0.0).astype(jnp.float32)
    m2 = (i - 1) * r_img + rows2
    poolw = jnp.zeros((i, m2), jnp.float32)
    for ii in range(i):
        poolw = poolw.at[ii, ii * r_img: ii * r_img + rows2].set(pw_row)

    pooled = encoder_pallas(patches, params["w1"], params["b1"], mask,
                            params["w2"], params["b2"], poolw, wp=wp)
    return pooled.reshape(bp, -1)[:b, :C2]                # drop lane padding


# Pure-JAX f32 reference (mirrors the PyTorch module's forward) for validation.
def reference_forward(raw, x_nchw):
    x = jnp.transpose(x_nchw, (0, 2, 3, 1))
    dn = ("NHWC", "HWIO", "NHWC")
    y = lax.conv_general_dilated(x, raw["w1"], (1, 1), ((1, 1), (1, 1)),
                                 dimension_numbers=dn)
    y = jax.nn.relu(y + raw["b1"])
    y = lax.conv_general_dilated(y, raw["w2"], (2, 2), ((1, 1), (1, 1)),
                                 dimension_numbers=dn)
    y = jax.nn.relu(y + raw["b2"])
    return jnp.mean(y, axis=(1, 2))


# TODO(synk): the reference wraps an arbitrary pretrained timm backbone
# (e.g. resnet50); only a representative 2-layer conv encoder + global average
# pool with deterministic synthetic weights is reproduced here.


if __name__ == "__main__":
    B, C, H, W = 2, C_IN, 16, 16
    key = jax.random.PRNGKey(0)
    x = jax.random.normal(key, (B, C, H, W), jnp.float32)   # NCHW like PyTorch

    raw = init_params(cin=C)
    params = pack_params(raw)

    out = image_encoder_forward(params, x)                  # grid=(2,), 1 img/step
    jax.block_until_ready(out)

    assert out.shape == (B, C2), out.shape
    assert out.dtype == jnp.float32
    assert bool(jnp.all(jnp.isfinite(out)))

    # Validate against the f32 reference (bf16 MXU operands -> loose tolerance).
    ref = reference_forward(raw, x)
    assert jnp.allclose(out, ref, atol=3e-2, rtol=3e-2), \
        float(jnp.max(jnp.abs(out - ref)))

    print("KERNEL_OK")
</pallas_src>

<mosaic_0001>
module attributes {stable_mosaic.version = 11 : i64} {
  func.func @_encoder_kernel(%arg0: i32, %arg1: memref<1x342x36xbf16, #tpu.memory_space<vmem>>, %arg2: memref<36x32xbf16, #tpu.memory_space<vmem>>, %arg3: memref<1x32xf32, #tpu.memory_space<vmem>>, %arg4: memref<342x1xf32, #tpu.memory_space<vmem>>, %arg5: memref<288x128xbf16, #tpu.memory_space<vmem>>, %arg6: memref<1x128xf32, #tpu.memory_space<vmem>>, %arg7: memref<1x288xf32, #tpu.memory_space<vmem>>, %arg8: memref<1x1x128xf32, #tpu.memory_space<vmem>>, %arg9: memref<342x32xbf16, #tpu.memory_space<vmem>>) attributes {dimension_semantics = [#tpu.dimension_semantics<parallel>], iteration_bounds = array<i64: 2>, scalar_prefetch = 0 : i64, scratch_operands = 1 : i64, tpu.core_type = #tpu.core_type<tc>, window_params = [{transform_indices = @transform_0, window_bounds = array<i64: 1, 342, 36>}, {pipeline_mode = #tpu.pipeline_mode<synchronous>, transform_indices = @transform_1, window_bounds = array<i64: 36, 32>}, {pipeline_mode = #tpu.pipeline_mode<synchronous>, transform_indices = @transform_2, window_bounds = array<i64: 1, 32>}, {pipeline_mode = #tpu.pipeline_mode<synchronous>, transform_indices = @transform_3, window_bounds = array<i64: 342, 1>}, {pipeline_mode = #tpu.pipeline_mode<synchronous>, transform_indices = @transform_4, window_bounds = array<i64: 288, 128>}, {pipeline_mode = #tpu.pipeline_mode<synchronous>, transform_indices = @transform_5, window_bounds = array<i64: 1, 128>}, {pipeline_mode = #tpu.pipeline_mode<synchronous>, transform_indices = @transform_6, window_bounds = array<i64: 1, 288>}, {transform_indices = @transform_7, window_bounds = array<i64: 1, 1, 128>}]} {
    %c0 = arith.constant 0 : index
    %c0_0 = arith.constant 0 : index
    %c0_1 = arith.constant 0 : index
    %0 = vector.load %arg1[%c0, %c0_0, %c0_1] : memref<1x342x36xbf16, #tpu.memory_space<vmem>>, vector<1x342x36xbf16>
    %1 = vector.shape_cast %0 : vector<1x342x36xbf16> to vector<342x36xbf16>
    %c0_2 = arith.constant 0 : index
    %c0_3 = arith.constant 0 : index
    %2 = vector.load %arg2[%c0_2, %c0_3] : memref<36x32xbf16, #tpu.memory_space<vmem>>, vector<36x32xbf16>
    %cst = arith.constant dense<0.000000e+00> : vector<342x32xf32>
    %3 = tpu.matmul %1, %2, %cst {dimension_numbers = #tpu.dot_dimension_numbers<[1], [0], [0], [1], [0, 0, 1, 1], [], []>} : vector<342x36xbf16>, vector<36x32xbf16>, vector<342x32xf32> -> vector<342x32xf32>
    %c0_4 = arith.constant 0 : index
    %c0_5 = arith.constant 0 : index
    %4 = vector.load %arg3[%c0_4, %c0_5] : memref<1x32xf32, #tpu.memory_space<vmem>>, vector<1x32xf32>
    %5 = vector.broadcast %4 : vector<1x32xf32> to vector<342x32xf32>
    %6 = arith.addf %3, %5 : vector<342x32xf32>
    %cst_6 = arith.constant 0.000000e+00 : f32
    %7 = vector.broadcast %cst_6 : f32 to vector<342x32xf32>
    %8 = arith.maximumf %6, %7 : vector<342x32xf32>
    %c0_7 = arith.constant 0 : index
    %c0_8 = arith.constant 0 : index
    %9 = vector.load %arg4[%c0_7, %c0_8] : memref<342x1xf32, #tpu.memory_space<vmem>>, vector<342x1xf32>
    %cst_9 = arith.constant 5.000000e-01 : f32
    %10 = vector.broadcast %cst_9 : f32 to vector<342x1xf32>
    %11 = arith.cmpf ogt, %9, %10 : vector<342x1xf32>
    %cst_10 = arith.constant 0.000000e+00 : f32
    %12 = vector.shape_cast %11 : vector<342x1xi1> to vector<342x1xi1>
    %13 = vector.broadcast %12 : vector<342x1xi1> to vector<342x32xi1>
    %14 = vector.broadcast %cst_10 : f32 to vector<342x32xf32>
    %15 = arith.select %13, %8, %14 : vector<342x32xi1>, vector<342x32xf32>
    %16 = arith.truncf %15 : vector<342x32xf32> to vector<342x32xbf16>
    %c0_11 = arith.constant 0 : index
    %c0_12 = arith.constant 0 : index
    %17 = vector.load %arg9[%c0_11, %c0_12] : memref<342x32xbf16, #tpu.memory_space<vmem>>, vector<342x32xbf16>
    tpu.vector_store %arg9[%c0_11, %c0_12], %16 {strides = array<i32>} : memref<342x32xbf16, #tpu.memory_space<vmem>>, vector<342x32xbf16>,
    %c0_13 = arith.constant 0 : index
    %c0_14 = arith.constant 0 : index
    %18 = vector.load %arg9[%c0_13, %c0_14] : memref<342x32xbf16, #tpu.memory_space<vmem>>, vector<288x32xbf16>
    %c1 = arith.constant 1 : index
    %c0_15 = arith.constant 0 : index
    %19 = vector.load %arg9[%c1, %c0_15] : memref<342x32xbf16, #tpu.memory_space<vmem>>, vector<288x32xbf16>
    %c2 = arith.constant 2 : index
    %c0_16 = arith.constant 0 : index
    %20 = vector.load %arg9[%c2, %c0_16] : memref<342x32xbf16, #tpu.memory_space<vmem>>, vector<288x32xbf16>
    %c18 = arith.constant 18 : index
    %c0_17 = arith.constant 0 : index
    %21 = vector.load %arg9[%c18, %c0_17] : memref<342x32xbf16, #tpu.memory_space<vmem>>, vector<288x32xbf16>
    %c19 = arith.constant 19 : index
    %c0_18 = arith.constant 0 : index
    %22 = vector.load %arg9[%c19, %c0_18] : memref<342x32xbf16, #tpu.memory_space<vmem>>, vector<288x32xbf16>
    %c20 = arith.constant 20 : index
    %c0_19 = arith.constant 0 : index
    %23 = vector.load %arg9[%c20, %c0_19] : memref<342x32xbf16, #tpu.memory_space<vmem>>, vector<288x32xbf16>
    %c36 = arith.constant 36 : index
    %c0_20 = arith.constant 0 : index
    %24 = vector.load %arg9[%c36, %c0_20] : memref<342x32xbf16, #tpu.memory_space<vmem>>, vector<288x32xbf16>
    %c37 = arith.constant 37 : index
    %c0_21 = arith.constant 0 : index
    %25 = vector.load %arg9[%c37, %c0_21] : memref<342x32xbf16, #tpu.memory_space<vmem>>, vector<288x32xbf16>
    %c38 = arith.constant 38 : index
    %c0_22 = arith.constant 0 : index
    %26 = vector.load %arg9[%c38, %c0_22] : memref<342x32xbf16, #tpu.memory_space<vmem>>, vector<288x32xbf16>
    %27 = tpu.concatenate %18, %19, %20, %21, %22, %23, %24, %25, %26 in 1 : vector<288x32xbf16>, vector<288x32xbf16>, vector<288x32xbf16>, vector<288x32xbf16>, vector<288x32xbf16>, vector<288x32xbf16>, vector<288x32xbf16>, vector<288x32xbf16>, vector<288x32xbf16> -> vector<288x288xbf16>
    %c0_23 = arith.constant 0 : index
    %c0_24 = arith.constant 0 : index
    %28 = vector.load %arg5[%c0_23, %c0_24] : memref<288x128xbf16, #tpu.memory_space<vmem>>, vector<288x128xbf16>
    %cst_25 = arith.constant dense<0.000000e+00> : vector<288x128xf32>
    %29 = tpu.matmul %27, %28, %cst_25 {dimension_numbers = #tpu.dot_dimension_numbers<[1], [0], [0], [1], [0, 0, 1, 1], [], []>} : vector<288x288xbf16>, vector<288x128xbf16>, vector<288x128xf32> -> vector<288x128xf32>
    %c0_26 = arith.constant 0 : index
    %c0_27 = arith.constant 0 : index
    %30 = vector.load %arg6[%c0_26, %c0_27] : memref<1x128xf32, #tpu.memory_space<vmem>>, vector<1x128xf32>
    %31 = vector.broadcast %30 : vector<1x128xf32> to vector<288x128xf32>
    %32 = arith.addf %29, %31 : vector<288x128xf32>
    %cst_28 = arith.constant 0.000000e+00 : f32
    %33 = vector.broadcast %cst_28 : f32 to vector<288x128xf32>
    %34 = arith.maximumf %32, %33 : vector<288x128xf32>
    %c0_29 = arith.constant 0 : index
    %c0_30 = arith.constant 0 : index
    %35 = vector.load %arg7[%c0_29, %c0_30] : memref<1x288xf32, #tpu.memory_space<vmem>>, vector<1x288xf32>
    %cst_31 = arith.constant dense<0.000000e+00> : vector<1x128xf32>
    %36 = tpu.matmul %35, %34, %cst_31 {dimension_numbers = #tpu.dot_dimension_numbers<[1], [0], [0], [1], [0, 0, 1, 1], [], []>} : vector<1x288xf32>, vector<288x128xf32>, vector<1x128xf32> -> vector<1x128xf32>
    %c0_32 = arith.constant 0 : index
    %c0_33 = arith.constant 0 : index
    %c0_34 = arith.constant 0 : index
    %37 = vector.load %arg8[%c0_32, %c0_33, %c0_34] : memref<1x1x128xf32, #tpu.memory_space<vmem>>, vector<1x1x128xf32>
    %38 = vector.shape_cast %37 : vector<1x1x128xf32> to vector<1x128xf32>
    %39 = vector.shape_cast %36 : vector<1x128xf32> to vector<1x1x128xf32>
    tpu.vector_store %arg8[%c0_32, %c0_33, %c0_34], %39 {strides = array<i32>} : memref<1x1x128xf32, #tpu.memory_space<vmem>>, vector<1x1x128xf32>,
    return
  }
  func.func @transform_0(%arg0: i32) -> (i32, i32, i32) {
    %c0_i32 = arith.constant 0 : i32
    %c0_i32_0 = arith.constant 0 : i32
    %c0_i32_1 = arith.constant 0 : i32
    return %arg0, %c0_i32, %c0_i32_0 : i32, i32, i32
  }
  func.func @transform_1(%arg0: i32) -> (i32, i32) {
    %c0_i32 = arith.constant 0 : i32
    %c0_i32_0 = arith.constant 0 : i32
    %c0_i32_1 = arith.constant 0 : i32
    return %c0_i32, %c0_i32_0 : i32, i32
  }
  func.func @transform_2(%arg0: i32) -> (i32, i32) {
    %c0_i32 = arith.constant 0 : i32
    %c0_i32_0 = arith.constant 0 : i32
    %c0_i32_1 = arith.constant 0 : i32
    return %c0_i32, %c0_i32_0 : i32, i32
  }
  func.func @transform_3(%arg0: i32) -> (i32, i32) {
    %c0_i32 = arith.constant 0 : i32
    %c0_i32_0 = arith.constant 0 : i32
    %c0_i32_1 = arith.constant 0 : i32
    return %c0_i32, %c0_i32_0 : i32, i32
  }
  func.func @transform_4(%arg0: i32) -> (i32, i32) {
    %c0_i32 = arith.constant 0 : i32
    %c0_i32_0 = arith.constant 0 : i32
    %c0_i32_1 = arith.constant 0 : i32
    return %c0_i32, %c0_i32_0 : i32, i32
  }
  func.func @transform_5(%arg0: i32) -> (i32, i32) {
    %c0_i32 = arith.constant 0 : i32
    %c0_i32_0 = arith.constant 0 : i32
    %c0_i32_1 = arith.constant 0 : i32
    return %c0_i32, %c0_i32_0 : i32, i32
  }
  func.func @transform_6(%arg0: i32) -> (i32, i32) {
    %c0_i32 = arith.constant 0 : i32
    %c0_i32_0 = arith.constant 0 : i32
    %c0_i32_1 = arith.constant 0 : i32
    return %c0_i32, %c0_i32_0 : i32, i32
  }
  func.func @transform_7(%arg0: i32) -> (i32, i32, i32) {
    %c0_i32 = arith.constant 0 : i32
    %c0_i32_0 = arith.constant 0 : i32
    %c0_i32_1 = arith.constant 0 : i32
    return %arg0, %c0_i32, %c0_i32_0 : i32, i32, i32
  }
}

</mosaic_0001>

<bundles_post_ra>
// kernel: image_encoder_forward.1
= control target key start
LH: loop header
LB: loop body
LE: loop exit
PB: predicated region body
PF: predicated region fallthrough
CT: control target
= control target key end

     0   :  { %12 = vsyncpa [#allocation4], 0  ;;  %s5711_s0 = inlined_call_operand.vmem [shape: bf16[2,342,36], index: 0, kind: input, shape index: {}]   ;;  %s5712_s1 = inlined_call_operand.vmem [shape: bf16[36,32], index: 1, kind: input, shape index: {}]   ;;  %s5713_s2 = inlined_call_operand.vmem [shape: f32[1,32], index: 2, kind: input, shape index: {}]   ;;  %s5714_s3 = inlined_call_operand.vmem [shape: f32[342,1], index: 3, kind: input, shape index: {}]   ;;  %s5715_s4 = inlined_call_operand.vmem [shape: bf16[288,128], index: 4, kind: input, shape index: {}]   ;;  %s5716_s5 = inlined_call_operand.vmem [shape: f32[1,128], index: 5, kind: input, shape index: {}]   ;;  %s5717_s6 = inlined_call_operand.vmem [shape: f32[1,288], index: 6, kind: input, shape index: {}]   ;;  %s5718_s7 = inlined_call_operand.hbm [shape: f32[2,1,128], index: 7, kind: output, shape index: {}]  }
   0x1   :  { %14 = vsyncpa [#allocation4 + $0x1], 0  ;;  %s3999_s24 = smov 0   ;;  %s4001_s25 = smov 0  }
   0x2   :  { %s4003_s26 = smov 0   ;;  %s4005_s27 = smov 0  }
   0x3 LB: > { %s4020_s28 = sadd.s32 4294967295, %s3949_s27   ;;  %s3287_s29 = sadd.s32 4294967294, %s3949_s27   ;;  %s3949_s27 = sphi %s4005_s27, %s5767_s27   ;;  %s3945_s26 = sphi %s4003_s26, %s5766_s26   ;;  %s3941_s25 = sphi %s4001_s25, %s5765_s25   ;;  %s3937_s24 = sphi %s3999_s24, %s5764_s24  }
   0x4   : > { %s4024_s30 = sadd.s32 1, %s3949_s27   ;;  %s179_s8 = sadd.s32 1, %s3945_s26 }
   0x5   : > { %s176_s9 = ssub.s32 %s3949_s27, %s4024_s30  ;;  %p189_p0 = scmp.ne.s32.totalorder %s3945_s26, %s3941_s25 }
   0x6   : > { %p177_p1 = scmp.eq.s32.totalorder %s176_s9, 0  ;;  %p190_p2 = scmp.eq.s32.totalorder %s4020_s28, 1 }
   0x7   : > { %p195_p3 = scmp.ne.s32.totalorder %s3941_s25, %s3937_s24  ;;  %p196_p4 = scmp.eq.s32.totalorder %s3287_s29, 1 }
   0x8   : > { %s4035_s10 = scalar_select %p177_p1, %s3945_s26, %s179_s8  }
   0x9   : > { %p4037_p5 = por %p190_p2, %p189_p0  ;;  %p4041_p6 = por %p196_p4, %p195_p3 }
   0xa   : > { %p3290_p7 = scmp.ge.s32.totalorder %s3949_s27, 1  ;;  %p240_p8 = scmp.lt.s32.totalorder %s3949_s27, 3 }
   0xc   : > { %p241_p9 = pnand %p3290_p7, %p240_p8 }
   0xe   : > { %244 = sbr.rel (%p241_p9) target bundleno = 1061 (0x425), region = 48 }
  0x15   : > { %v783_v0 = vld [vmem:[%s5714_s3 + $0x30] sm:$0xff]  ;;  %v5719_v2 = vmov 0   ;;  %v3803_v3 = vld [vmem:[%s5712_s1] sm:$0xff]   ;;  %v784_v4 = vld [vmem:[%s5714_s3 + $0x38] sm:$0xff]  ;;  %p271_p10 = scmp.lt.s32.totalorder %s4020_s28, 1  ;;  %vm522_vm6 = vcmask 1041408  }
  0x16   : > { %v779_v1 = vld [vmem:[%s5714_s3 + $0x10] sm:$0xff]  ;;  %3802 = vset.pattern.permute.xlu1 %v5719_v2  ;;  %3801 = vset.pattern.permute.xlu0 %v5719_v2  ;;  %vm826_vm0 = vcmp.gt.f32.partialorder %v783_v0, 0.5  ;;  %vm827_vm2 = vcmp.gt.f32.partialorder %v784_v4, 0.5  ;;  %v780_v7 = vld [vmem:[%s5714_s3 + $0x18] sm:$0xff]  ;;  %v3804_v8 = vld [vmem:[%s5712_s1 + $0x8] sm:$0xff]   ;;  %vm455_vm9 = vcmask 293888  }
  0x17   : > { %vm822_vm1 = vcmp.gt.f32.partialorder %v779_v1, 0.5  ;;  %v869_v5 = vsel %vm826_vm0, 1, %v5719_v2  ;;  %3721 = vmatprep.subr.bf16.mxu1 %v5719_v2  ;;  %vm823_vm3 = vcmp.gt.f32.partialorder %v780_v7, 0.5  ;;  %v786_v9 = vld [vmem:[%s5714_s3 + $0x48] sm:$0xff]  ;;  %3582 = vmatprep.subr.bf16.mxu0 %v3803_v3  ;;  %v870_v10 = vsel %vm827_vm2, 1, %v5719_v2  ;;  %v785_v12 = vld [vmem:[%s5714_s3 + $0x40] sm:$0xff] }
  0x18   : > { %v865_v6 = vsel %vm822_vm1, 1, %v5719_v2  ;;  %925 = vperm.xlu1 %3802, %v869_v5   ;;  %v866_v11 = vsel %vm823_vm3, 1, %v5719_v2  ;;  %3583 = vmatpush3.bf16.msra.mxu0 %v3803_v3  ;;  %vm829_vm4 = vcmp.gt.f32.partialorder %v786_v9, 0.5  ;;  %vm828_vm5 = vcmp.gt.f32.partialorder %v785_v12, 0.5  ;;  %s272_s17 = scalar_select %p271_p10, %s4020_s28, 1  ;;  %v782_v14 = vld [vmem:[%s5714_s3 + $0x28] sm:$0xff] }
  0x19   : > { %913 = vperm.xlu0 %3801, %v865_v6   ;;  %3584 = vmatprep.subr.bf16.mxu0 %v3804_v8  ;;  %v3805_v13 = vld [vmem:[%s5712_s1 + $0x10] ss:$0 sps:$4 sm:$0x33]   ;;  %v781_v15 = vld [vmem:[%s5714_s3 + $0x20] sm:$0xff]  ;;  %v788_v16 = vld [vmem:[%s5714_s3 + $0x58] sm:$0xff]  ;;  %v872_v17 = vsel %vm829_vm4, 1, %v5719_v2 }
  0x1a   : > { %v871_v18 = vsel %vm828_vm5, 1, %v5719_v2  ;;  %s3754_s29 = smul.u32 172, %s272_s17  ;;  %vm825_vm7 = vcmp.gt.f32.partialorder %v782_v14, 0.5  ;;  %vm824_vm8 = vcmp.gt.f32.partialorder %v781_v15, 0.5  ;;  %v524_v19 = vsel %vm522_vm6, %v3805_v13, 0  ;;  %v787_v20 = vld [vmem:[%s5714_s3 + $0x50] sm:$0xff] }
  0x1b   : > { %vm831_vm10 = vcmp.gt.f32.partialorder %v788_v16, 0.5  ;;  %v868_v22 = vsel %vm825_vm7, 1, %v5719_v2  ;;  %v790_v23 = vld [vmem:[%s5714_s3 + $0x68] sm:$0xff]  ;;  %v867_v24 = vsel %vm824_vm8, 1, %v5719_v2  ;;  %vm830_vm11 = vcmp.gt.f32.partialorder %v787_v20, 0.5  ;;  %v789_v27 = vld [vmem:[%s5714_s3 + $0x60] sm:$0xff] }
  0x1c   : > { %928 = vperm.xlu1 %3802, %v870_v10   ;;  %3585 = vmatpush3.bf16.msra.mxu0 %v3804_v8  ;;  %s4097_s13 = scalar_lea.vmem %s5711_s0, %s3754_s29  ;;  %v874_v28 = vsel %vm831_vm10, 1, %v5719_v2  ;;  %v873_v29 = vsel %vm830_vm11, 1, %v5719_v2  ;;  %vm833_vm12 = vcmp.gt.f32.partialorder %v790_v23, 0.5  ;;  %vm832_vm13 = vcmp.gt.f32.partialorder %v789_v27, 0.5  ;;  %v792_v30 = vld [vmem:[%s5714_s3 + $0x78] sm:$0xff]  ;;  %v791_v31 = vld [vmem:[%s5714_s3 + $0x70] sm:$0xff] }
  0x1d   : > { %916 = vperm.xlu0 %3801, %v866_v11   ;;  %3753 = vmatprep.subr.msk.bf16.mxu0 %vm522_vm6, %v3805_v13  ;;  %v3806_v21 = vld [vmem:[%s4097_s13] sm:$0xff]   ;;  %v3807_v25 = vld [vmem:[%s4097_s13 + $0x8] sm:$0xff]   ;;  %v3808_v26 = vld [vmem:[%s4097_s13 + $0x10] sm:$0xff]   ;;  %v876_v32 = vsel %vm833_vm12, 1, %v5719_v2  ;;  %v875_v33 = vsel %vm832_vm13, 1, %v5719_v2  ;;  %vm835_vm14 = vcmp.gt.f32.partialorder %v792_v30, 0.5 }
  0x1e   : > { %3588 = vmatprep.mubr.msk.bf16.mxu0 %vm455_vm9, %v3806_v21  ;;  %v3809_v34 = vld [vmem:[%s4097_s13 + $0x18] sm:$0xff]   ;;  %vm834_vm15 = vcmp.gt.f32.partialorder %v791_v31, 0.5  ;;  %v3810_v35 = vld [vmem:[%s4097_s13 + $0x20] sm:$0xff]   ;;  %v794_v36 = vld [vmem:[%s5714_s3 + $0x88] sm:$0xff]  ;;  %v878_v38 = vsel %vm835_vm14, 1, %v5719_v2  ;;  %s3952_s22 = smov 64  }
  0x1f   : > { %v793_v37 = vld [vmem:[%s5714_s3 + $0x80] sm:$0xff]  ;;  %v877_v39 = vsel %vm834_vm15, 1, %v5719_v2  ;;  %v796_v40 = vld [vmem:[%s5714_s3 + $0x98] sm:$0xff]  ;;  %vm837_vm0 = vcmp.gt.f32.partialorder %v794_v36, 0.5  ;;  %v795_v41 = vld [vmem:[%s5714_s3 + $0x90] sm:$0xff]  ;;  %s3953_s8 = smov 32  }
  0x20   : > { %934 = vperm.xlu1 %3802, %v872_v17   ;;  %3587 = vmatpush3.bf16.msra.mxu0 %v524_v19  ;;  %vm836_vm1 = vcmp.gt.f32.partialorder %v793_v37, 0.5  ;;  %v880_v42 = vsel %vm837_vm0, 1, %v5719_v2  ;;  %v3811_v44 = vld [vmem:[%s4097_s13 + $0x28] sm:$0xff]   ;;  %vm839_vm2 = vcmp.gt.f32.partialorder %v796_v40, 0.5  ;;  %v3812_v45 = vld [vmem:[%s4097_s13 + $0x30] sm:$0xff]   ;;  %vm838_vm3 = vcmp.gt.f32.partialorder %v795_v41, 0.5 }
  0x21   : > { %931 = vperm.xlu0 %3801, %v871_v18   ;;  %2670 = vmatprep.subr.bf16.mxu0 %v5719_v2  ;;  %v879_v43 = vsel %vm836_vm1, 1, %v5719_v2  ;;  %v798_v46 = vld [vmem:[%s5714_s3 + $0xa8] sm:$0xff]  ;;  %v797_v47 = vld [vmem:[%s5714_s3 + $0xa0] sm:$0xff]  ;;  %v882_v48 = vsel %vm839_vm2, 1, %v5719_v2  ;;  %v881_v49 = vsel %vm838_vm3, 1, %v5719_v2  ;;  %v3813_v52 = vld [vmem:[%s4097_s13 + $0x38] sm:$0xff]  }
  0x22   : > { %vm841_vm4 = vcmp.gt.f32.partialorder %v798_v46, 0.5  ;;  %v778_v50 = vld [vmem:[%s5714_s3 + $0x8] sm:$0xff]  ;;  %vm840_vm5 = vcmp.gt.f32.partialorder %v797_v47, 0.5  ;;  %v777_v51 = vld [vmem:[%s5714_s3] sm:$0xff]  ;;  %v800_v53 = vld [vmem:[%s5714_s3 + $0xb8] sm:$0xff]  ;;  %s3954_s16 = smov 96  }
  0x23   : > { %3589 = vmatmul.mubr.msk.bf16.vlgmr.msra.gmra.mrb[0].mxu0 %vm455_vm9, %v3807_v25  ;;  %vm821_vm6 = vcmp.gt.f32.partialorder %v778_v50, 0.5  ;;  %v3814_v54 = vld [vmem:[%s4097_s13 + $0x40] sm:$0xff]   ;;  %v884_v55 = vsel %vm841_vm4, 1, %v5719_v2  ;;  %v883_v56 = vsel %vm840_vm5, 1, %v5719_v2  ;;  %vm820_vm7 = vcmp.gt.f32.partialorder %v777_v51, 0.5  ;;  %v799_v57 = vld [vmem:[%s5714_s3 + $0xb0] sm:$0xff] }
  0x24   : > { %922 = vperm.xlu1 %3802, %v868_v22   ;;  %3592 = vmatprep.mubr.msk.bf16.mxu0 %vm455_vm9, %v3808_v26  ;;  %v802_v58 = vld [vmem:[%s5714_s3 + $0xc8] sm:$0xff]  ;;  %v801_v59 = vld [vmem:[%s5714_s3 + $0xc0] sm:$0xff]  ;;  %vm843_vm8 = vcmp.gt.f32.partialorder %v800_v53, 0.5  ;;  %v804_v60 = vld [vmem:[%s5714_s3 + $0xd8] sm:$0xff]  ;;  %v864_v61 = vsel %vm821_vm6, 1, %v5719_v2  ;;  %v863_v63 = vsel %vm820_vm7, 1, %v5719_v2 }
  0x25   : > { %919 = vperm.xlu0 %3801, %v867_v24   ;;  %v803_v62 = vld [vmem:[%s5714_s3 + $0xd0] sm:$0xff]  ;;  %vm842_vm10 = vcmp.gt.f32.partialorder %v799_v57, 0.5  ;;  %v886_v0 = vsel %vm843_vm8, 1, %v5719_v2  ;;  %vm845_vm11 = vcmp.gt.f32.partialorder %v802_v58, 0.5  ;;  %vm844_vm12 = vcmp.gt.f32.partialorder %v801_v59, 0.5  ;;  %v806_v1 = vld [vmem:[%s5714_s3 + $0xe8] sm:$0xff] }
  0x26   : > { %vm847_vm13 = vcmp.gt.f32.partialorder %v804_v60, 0.5  ;;  %vm846_vm14 = vcmp.gt.f32.partialorder %v803_v62, 0.5  ;;  %v885_v3 = vsel %vm842_vm10, 1, %v5719_v2  ;;  %v805_v4 = vld [vmem:[%s5714_s3 + $0xe0] sm:$0xff]  ;;  %v3815_v5 = vld [vmem:[%s4097_s13 + $0x48] sm:$0xff]   ;;  %v888_v6 = vsel %vm845_vm11, 1, %v5719_v2 }
  0x27   : > { %v887_v7 = vsel %vm844_vm12, 1, %v5719_v2  ;;  %v3816_v8 = vld [vmem:[%s4097_s13 + $0x50] sm:$0xff]   ;;  %v890_v9 = vsel %vm847_vm13, 1, %v5719_v2  ;;  %v889_v10 = vsel %vm846_vm14, 1, %v5719_v2  ;;  %vm849_vm15 = vcmp.gt.f32.partialorder %v806_v1, 0.5  ;;  %v3817_v11 = vld [vmem:[%s4097_s13 + $0x58] sm:$0xff]  }
  0x28   : > { %940 = vperm.xlu1 %3802, %v874_v28   ;;  %vm848_vm0 = vcmp.gt.f32.partialorder %v805_v4, 0.5  ;;  %v3818_v12 = vld [vmem:[%s4097_s13 + $0x60] sm:$0xff]   ;;  %v808_v13 = vld [vmem:[%s5714_s3 + $0xf8] sm:$0xff]  ;;  %v807_v14 = vld [vmem:[%s5714_s3 + $0xf0] sm:$0xff]  ;;  %v892_v15 = vsel %vm849_vm15, 1, %v5719_v2  ;;  %vm1294_vm14 = vcmask 257024  }
  0x29   : > { %937 = vperm.xlu0 %3801, %v873_v29   ;;  %v891_v16 = vsel %vm848_vm0, 1, %v5719_v2  ;;  %vm851_vm1 = vcmp.gt.f32.partialorder %v808_v13, 0.5  ;;  %vm850_vm2 = vcmp.gt.f32.partialorder %v807_v14, 0.5  ;;  %v810_v17 = vld [vmem:[%s5714_s3 + $0x108] sm:$0xff]  ;;  %v809_v18 = vld [vmem:[%s5714_s3 + $0x100] sm:$0xff]  ;;  %v3820_v22 = vld [vmem:[%s4097_s13 + $0x70] sm:$0xff]  }
  0x2a   : > { %v894_v19 = vsel %vm851_vm1, 1, %v5719_v2  ;;  %v893_v20 = vsel %vm850_vm2, 1, %v5719_v2  ;;  %v3819_v21 = vld [vmem:[%s4097_s13 + $0x68] sm:$0xff]   ;;  %vm853_vm3 = vcmp.gt.f32.partialorder %v810_v17, 0.5  ;;  %vm852_vm4 = vcmp.gt.f32.partialorder %v809_v18, 0.5  ;;  %v812_v23 = vld [vmem:[%s5714_s3 + $0x118] sm:$0xff] }
  0x2b   : > { %3593 = vmatmul.mubr.msk.bf16.gmra.mrb[4].mxu0 %vm455_vm9, %v3809_v34  ;;  %v811_v24 = vld [vmem:[%s5714_s3 + $0x110] sm:$0xff]  ;;  %v896_v25 = vsel %vm853_vm3, 1, %v5719_v2  ;;  %v895_v26 = vsel %vm852_vm4, 1, %v5719_v2  ;;  %vm855_vm5 = vcmp.gt.f32.partialorder %v812_v23, 0.5  ;;  %v814_v27 = vld [vmem:[%s5714_s3 + $0x128] sm:$0xff]  ;;  %v813_v28 = vld [vmem:[%s5714_s3 + $0x120] sm:$0xff] }
  0x2c   : > { %946 = vperm.xlu1 %3802, %v876_v32   ;;  %3596 = vmatprep.mubr.msk.bf16.mxu0 %vm455_vm9, %v3810_v35  ;;  %vm854_vm6 = vcmp.gt.f32.partialorder %v811_v24, 0.5  ;;  %v898_v29 = vsel %vm855_vm5, 1, %v5719_v2  ;;  %v3821_v31 = vld [vmem:[%s4097_s13 + $0x78] sm:$0xff]   ;;  %vm857_vm7 = vcmp.gt.f32.partialorder %v814_v27, 0.5  ;;  %vm856_vm8 = vcmp.gt.f32.partialorder %v813_v28, 0.5  ;;  %v3822_v32 = vld [vmem:[%s4097_s13 + $0x80] sm:$0xff]  }
  0x2d   : > { %943 = vperm.xlu0 %3801, %v875_v33   ;;  %v897_v30 = vsel %vm854_vm6, 1, %v5719_v2  ;;  %v816_v33 = vld [vmem:[%s5714_s3 + $0x138] sm:$0xff]  ;;  %v815_v34 = vld [vmem:[%s5714_s3 + $0x130] sm:$0xff]  ;;  %v900_v35 = vsel %vm857_vm7, 1, %v5719_v2  ;;  %v899_v36 = vsel %vm856_vm8, 1, %v5719_v2  ;;  %v817_v37 = vld [vmem:[%s5714_s3 + $0x140] sm:$0xff] }
  0x2e   : > { %vm859_vm10 = vcmp.gt.f32.partialorder %v816_v33, 0.5  ;;  %vm858_vm11 = vcmp.gt.f32.partialorder %v815_v34, 0.5  ;;  %v3823_v40 = vld [vmem:[%s4097_s13 + $0x88] sm:$0xff]   ;;  %vm860_vm12 = vcmp.gt.f32.partialorder %v817_v37, 0.5  ;;  %v3824_v41 = vld [vmem:[%s4097_s13 + $0x90] sm:$0xff]   ;;  %v3839_v59 = vld [vmem:[%s5715_s4] sm:$0xff]  }
  0x2f   : > { %3737 = vmatpush1.bf16.msra.mxu1 %v3839_v59  ;;  %2671 = vmatpush1.bf16.msra.mxu0 %v3839_v59  ;;  %v3847_v23 = vld [vmem:[%s5715_s4 + $0x30] sm:$0xff]   ;;  %vm1670_vm5 = vcmask 1046528   ;;  %vm1482_vm8 = vsmask.f32 7424  ;;  %s269_s21 = sand.u32 1, %s3941_s25   ;;  %s3451_s23 = sshll.u32 %s4020_s28, 4 }
  0x30   : > { %952 = vperm.xlu1 %3802, %v878_v38   ;;  %v902_v38 = vsel %vm859_vm10, 1, %v5719_v2  ;;  %3722 = vmatprep.subr.bf16.mxu1 %v5719_v2  ;;  %s270_s29 = scalar_lea.vmem [#allocation3], %s269_s21  ;;  %s5669_s15 = scalar_lea.hbm %s5718_s7, %s3451_s23 }
  0x31   : > { %949 = vperm.xlu0 %3801, %v877_v39   ;;  %v901_v39 = vsel %vm858_vm11, 1, %v5719_v2  ;;  %2672 = vmatprep.subr.bf16.mxu0 %v5719_v2  ;;  %s3220_s17 = scalar_lea.sflag [#allocation4], %s269_s21  ;;  %s3958_s28 = smov [#allocation3]  }
  0x32   : > { %s3891_s18 = sshll.u32 %s3958_s28, 4  ;;  %s3892_s18 = int_to_ptr.vmem [resolvable:$false] %s3891_s18 }
  0x33   : > { %3597 = vmatmul.mubr.msk.bf16.gmra.mrb[8].mxu0 %vm455_vm9, %v3811_v44  ;;  %v3826_v44 = vld [vmem:[%s4097_s13 + $0xa0] sm:$0xff]  }
  0x34   : > { %958 = vperm.xlu1 %3802, %v880_v42   ;;  %3600 = vmatprep.mubr.msk.bf16.mxu0 %vm455_vm9, %v3812_v45  ;;  %v903_v42 = vsel %vm860_vm12, 1, %v5719_v2  ;;  %v3827_v45 = vld [vmem:[%s4097_s13 + $0xa8] ss:$0 sps:$4 sm:$0x77]   ;;  %vm1894_vm12 = vcmask 1045504  }
  0x35   : > { %955 = vperm.xlu0 %3801, %v879_v43   ;;  %v3825_v43 = vld [vmem:[%s4097_s13 + $0x98] sm:$0xff]   ;;  %s3232_s13 = sshll.u32 %s270_s29, 4  ;;  %s5671_s13 = int_to_ptr.vmem [resolvable:$true] %s3232_s13 }
  0x36   : > { %p3894_p0 = scmp.lt.s32.totalorder %s5671_s13, %s3892_s18 }
  0x38   : > { %964 = vperm.xlu1 %3802, %v882_v48  }
  0x39   : > { %961 = vperm.xlu0 %3801, %v881_v49  }
  0x3b   : > { %3601 = vmatmul.mubr.msk.bf16.gmra.mrb[12].mxu0 %vm455_vm9, %v3813_v52 }
  0x3c   : > { %970 = vperm.xlu1 %3802, %v884_v55   ;;  %3604 = vmatprep.mubr.msk.bf16.mxu0 %vm455_vm9, %v3814_v54 }
  0x3d   : > { %967 = vperm.xlu0 %3801, %v883_v56  }
  0x40   : > { %910 = vperm.xlu1 %3802, %v864_v61   ;;  %v3840_v61 = vld [vmem:[%s5715_s4 + $0x8] sm:$0xff]  }
  0x41   : > { %907 = vperm.xlu0 %3801, %v863_v63   ;;  %3738 = vmatpush1.bf16.msra.mxu1 %v3840_v61 }
  0x42   : > { %2673 = vmatpush1.bf16.msra.mxu0 %v3840_v61  ;;  %3723 = vmatprep.subr.bf16.mxu1 %v5719_v2 }
  0x43   : > { %3605 = vmatmul.mubr.msk.bf16.gmra.mrb[16].mxu0 %vm455_vm9, %v3815_v5  ;;  %2674 = vmatprep.subr.bf16.mxu0 %v5719_v2  ;;  %v3844_v5 = vld [vmem:[%s5715_s4 + $0x20] sm:$0xff]  }
  0x44   : > { %976 = vperm.xlu1 %3802, %v886_v0   ;;  %3608 = vmatprep.mubr.msk.bf16.mxu0 %vm455_vm9, %v3816_v8  ;;  %v3841_v0 = vld [vmem:[%s5715_s4 + $0x10] sm:$0xff]  }
  0x45   : > { %973 = vperm.xlu0 %3801, %v885_v3   ;;  %3739 = vmatpush1.bf16.msra.mxu1 %v3841_v0  ;;  %v3843_v3 = vld [vmem:[%s5715_s4 + $0x18] sm:$0xff]  }
  0x46   : > { %2675 = vmatpush1.bf16.msra.mxu0 %v3841_v0  ;;  %3724 = vmatprep.subr.bf16.mxu1 %v5719_v2 }
  0x47   : > { %2676 = vmatprep.subr.bf16.mxu0 %v5719_v2 }
  0x48   : > { %982 = vperm.xlu1 %3802, %v888_v6  }
  0x49   : > { %979 = vperm.xlu0 %3801, %v887_v7   ;;  %3740 = vmatpush1.bf16.msra.mxu1 %v3843_v3  ;;  %v4340_v7 = vld [vmem:[%s5713_s2] ss:$0 sm:$0xff] }
  0x4a   : > { %2677 = vmatpush1.bf16.msra.mxu0 %v3843_v3  ;;  %3725 = vmatprep.subr.bf16.mxu1 %v5719_v2 }
  0x4b   : > { %3609 = vmatmul.mubr.msk.bf16.gmra.mrb[20].mxu0 %vm455_vm9, %v3817_v11  ;;  %2678 = vmatprep.subr.bf16.mxu0 %v5719_v2 }
  0x4c   : > { %988 = vperm.xlu1 %3802, %v890_v9   ;;  %3612 = vmatprep.mubr.msk.bf16.mxu0 %vm455_vm9, %v3818_v12  ;;  %v3846_v12 = vld [vmem:[%s5715_s4 + $0x28] sm:$0xff]  }
  0x4d   : > { %985 = vperm.xlu0 %3801, %v889_v10   ;;  %3741 = vmatpush1.bf16.msra.mxu1 %v3844_v5 }
  0x4e   : > { %2679 = vmatpush1.bf16.msra.mxu0 %v3844_v5  ;;  %3726 = vmatprep.subr.bf16.mxu1 %v5719_v2 }
  0x4f   : > { %2680 = vmatprep.subr.bf16.mxu0 %v5719_v2 }
  0x50   : > { %994 = vperm.xlu1 %3802, %v892_v15  }
  0x51   : > { %991 = vperm.xlu0 %3801, %v891_v16   ;;  %3742 = vmatpush1.bf16.msra.mxu1 %v3846_v12 }
  0x52   : > { %2681 = vmatpush1.bf16.msra.mxu0 %v3846_v12  ;;  %3727 = vmatprep.subr.bf16.mxu1 %v5719_v2 }
  0x53   : > { %3613 = vmatmul.mubr.msk.bf16.gmra.mrb[24].mxu0 %vm455_vm9, %v3819_v21  ;;  %2682 = vmatprep.subr.bf16.mxu0 %v5719_v2 }
  0x54   : > { %1000 = vperm.xlu1 %3802, %v894_v19   ;;  %3616 = vmatprep.mubr.msk.bf16.mxu0 %vm455_vm9, %v3820_v22 }
  0x55   : > { %997 = vperm.xlu0 %3801, %v893_v20   ;;  %3743 = vmatpush1.bf16.msra.mxu1 %v3847_v23 }
  0x56   : > { %2683 = vmatpush1.bf16.msra.mxu0 %v3847_v23  ;;  %3728 = vmatprep.subr.bf16.mxu1 %v5719_v2 }
  0x57   : > { %2684 = vmatprep.subr.bf16.mxu0 %v5719_v2 }
  0x58   : > { %1006 = vperm.xlu1 %3802, %v896_v25  }
  0x59   : > { %1003 = vperm.xlu0 %3801, %v895_v26  }
  0x5b   : > { %3617 = vmatmul.mubr.msk.bf16.gmra.mrb[28].mxu0 %vm455_vm9, %v3821_v31 }
  0x5c   : > { %1012 = vperm.xlu1 %3802, %v898_v29   ;;  %3620 = vmatprep.mubr.msk.bf16.mxu0 %vm455_vm9, %v3822_v32 }
  0x5d   : > { %1009 = vperm.xlu0 %3801, %v897_v30  }
  0x60   : > { %1018 = vperm.xlu1 %3802, %v900_v35  }
  0x61   : > { %1015 = vperm.xlu0 %3801, %v899_v36   ;;  %v3848_v36 = vld [vmem:[%s5715_s4 + $0x38] sm:$0xff]  }
  0x62   : > { %3744 = vmatpush1.bf16.msra.mxu1 %v3848_v36  ;;  %2685 = vmatpush1.bf16.msra.mxu0 %v3848_v36 }
  0x63   : > { %3621 = vmatmul.mubr.msk.bf16.gmra.mrb[32].mxu0 %vm455_vm9, %v3823_v40  ;;  %3729 = vmatprep.subr.bf16.mxu1 %v5719_v2 }
  0x64   : > { %1024 = vperm.xlu1 %3802, %v902_v38   ;;  %3624 = vmatprep.mubr.msk.bf16.mxu0 %vm455_vm9, %v3824_v41 }
  0x65   : > { %1021 = vperm.xlu0 %3801, %v901_v39   ;;  %2686 = vmatprep.subr.bf16.mxu0 %v5719_v2 }
  0x69   : > { %1027 = vperm.xlu0 %3801, %v903_v42  }
  0x6b   : > { %3625 = vmatmul.mubr.msk.bf16.gmra.mrb[36].mxu0 %vm455_vm9, %v3825_v43 }
  0x6c   : > { %3628 = vmatprep.mubr.msk.bf16.mxu0 %vm455_vm9, %v3826_v44 }
  0x73   : > { %3629 = vmatmul.mubr.msk.bf16.gmra.mrb[40].mxu0 %vm455_vm9, %v3827_v45 }
  0x97   : > { %v4278_v47 = vpop.permute.xlu1 %925 }
  0x98   : > { %v4276_v46 = vpop.permute.xlu0 %913  ;;  %vm1041_vm1 = vcmp.eq.s32.totalorder %v4278_v47, 1 }
  0x99   : > { %vm1037_vm9 = vcmp.eq.s32.totalorder %v4276_v46, 1  ;;  %v3849_v46 = vld [vmem:[%s5715_s4 + $0x40] sm:$0xff]  }
  0x9a   : > { %3745 = vmatpush1.bf16.msra.mxu1 %v3849_v46  ;;  %2687 = vmatpush1.bf16.msra.mxu0 %v3849_v46 }
  0x9b   : > { %v4282_v49 = vpop.permute.xlu1 %928  ;;  %3730 = vmatprep.subr.bf16.mxu1 %v5719_v2  ;;  %2688 = vmatprep.subr.bf16.mxu0 %v5719_v2 }
  0x9c   : > { %v4280_v48 = vpop.permute.xlu0 %916  ;;  %vm1042_vm3 = vcmp.eq.s32.totalorder %v4282_v49, 1 }
  0x9d   : > { %vm1038_vm15 = vcmp.eq.s32.totalorder %v4280_v48, 1 }
  0x9f   : > { %v4286_v51 = vpop.permute.xlu1 %934 }
  0xa0   : > { %v4284_v50 = vpop.permute.xlu0 %931  ;;  %vm1044_vm6 = vcmp.eq.s32.totalorder %v4286_v51, 1 }
  0xa1   : > { %vm1043_vm7 = vcmp.eq.s32.totalorder %v4284_v50, 1 }
  0xa3   : > { %v4290_v53 = vpop.permute.xlu1 %922 }
  0xa4   : > { %v4288_v52 = vpop.permute.xlu0 %919  ;;  %vm1040_vm4 = vcmp.eq.s32.totalorder %v4290_v53, 1 }
  0xa5   : > { %vm1039_vm2 = vcmp.eq.s32.totalorder %v4288_v52, 1 }
  0xa7   : > { %v4294_v55 = vpop.permute.xlu1 %940 }
  0xa8   : > { %v4292_v54 = vpop.permute.xlu0 %937  ;;  %vm1046_vm10 = vcmp.eq.s32.totalorder %v4294_v55, 1 }
  0xa9   : > { %vm1045_vm11 = vcmp.eq.s32.totalorder %v4292_v54, 1  ;;  %v3852_v54 = vld [vmem:[%s5715_s4 + $0x50] sm:$0xff]  }
  0xab   : > { %v4298_v57 = vpop.permute.xlu1 %946 }
  0xac   : > { %v4296_v56 = vpop.permute.xlu0 %943 }
  0xaf   : > { %v4305_v60 = vpop.permute.xlu1 %952 }
  0xb0   : > { %v4300_v58 = vpop.permute.xlu0 %949 }
  0xb3   : > { %v4314_v63 = vpop.permute.xlu1 %958 }
  0xb4   : > { %v4312_v62 = vpop.permute.xlu0 %955 }
  0xb7   : > { %v4328_v4 = vpop.permute.xlu1 %964 }
  0xb8   : > { %v4321_v1 = vpop.permute.xlu0 %961 }
  0xbb   : > { %v4342_v8 = vpop.permute.xlu1 %970 }
  0xbc   : > { %v4335_v6 = vpop.permute.xlu0 %967 }
  0xbf   : > { %v911_v24 = vpop.permute.xlu1 %910 }
  0xc0   : > { %v908_v18 = vpop.permute.xlu0 %907  ;;  %vm1036_vm0 = vcmp.eq.s32.totalorder %v911_v24, 1 }
  0xc1   : > { %vm1035_vm13 = vcmp.eq.s32.totalorder %v908_v18, 1 }
  0xf6   : > { %v3590_v9 = vpop.f32.mrb[0].mxu0 }
  0xf7   : > { %v569_v10 = vadd.f32 %v3590_v9, %v4340_v7  ;;  %v560_v11 = vpop.f32.mrb[1].mxu0 }
  0xf8   : > { %v561_v13 = vadd.f32 %v4340_v7, %v560_v11  ;;  %v3591_v14 = vpop.f32.mrb[2].mxu0 }
  0xf9   : > { %v736_v15 = vmax.f32 %v569_v10, 0.0  ;;  %v572_v16 = vadd.f32 %v3591_v14, %v4340_v7  ;;  %v563_v17 = vpop.f32.mrb[3].mxu0 }
  0xfa   : > { %v734_v19 = vmax.f32 %v561_v13, 0.0  ;;  %v564_v20 = vadd.f32 %v4340_v7, %v563_v17  ;;  %v3851_v13 = vld [vmem:[%s5715_s4 + $0x48] sm:$0xff]  }
  0xfb   : > { %v1080_v21 = vsel %vm1037_vm9, %v736_v15, 0.0  ;;  %v737_v22 = vmax.f32 %v572_v16, 0.0  ;;  %3746 = vmatpush1.bf16.msra.mxu1 %v3851_v13  ;;  %2689 = vmatpush1.bf16.msra.mxu0 %v3851_v13  ;;  %vm1047_vm9 = vcmp.eq.s32.totalorder %v4296_v56, 1 }
  0xfc   : > { %v3456_v25 = vpack.c.bf16 %v1080_v21, %v1080_v21  ;;  %v1078_v26 = vsel %vm1035_vm13, %v734_v19, 0.0  ;;  %v735_v27 = vmax.f32 %v564_v20, 0.0  ;;  %3731 = vmatprep.subr.bf16.mxu1 %v5719_v2  ;;  %2690 = vmatprep.subr.bf16.mxu0 %v5719_v2  ;;  %vm1050_vm13 = vcmp.eq.s32.totalorder %v4305_v60, 1 }
  0xfd   : > { %v3454_v28 = vpack.c.bf16 %v1078_v26, %v1078_v26  ;;  %v1081_v29 = vsel %vm1038_vm15, %v737_v22, 0.0  ;;  %vm1048_vm15 = vcmp.eq.s32.totalorder %v4298_v57, 1 }
  0xfe   : > { %1297 = vst.msk [vmem:[#allocation2 + $0x8] sm:$0xf] %vm1294_vm14, %v3456_v25  ;;  %v3457_v30 = vpack.c.bf16 %v1081_v29, %v1081_v29  ;;  %v1079_v31 = vsel %vm1036_vm0, %v735_v27, 0.0  ;;  %v3594_v32 = vpop.f32.mrb[4].mxu0  ;;  %vm1049_vm0 = vcmp.eq.s32.totalorder %v4300_v58, 1 }
  0xff   : > { %1295 = vst.msk [vmem:[#allocation2] sm:$0xf] %vm1294_vm14, %v3454_v28  ;;  %v3455_v33 = vpack.c.bf16 %v1079_v31, %v1079_v31  ;;  %v585_v34 = vadd.f32 %v3594_v32, %v4340_v7  ;;  %v576_v35 = vpop.f32.mrb[5].mxu0  ;;  %3747 = vmatpush1.bf16.msra.mxu1 %v3852_v54  ;;  %2691 = vmatpush1.bf16.msra.mxu0 %v3852_v54 }
 0x100   : > { %1298 = vst.msk [vmem:[#allocation2 + $0xc] sm:$0xf] %vm1294_vm14, %v3457_v30  ;;  %v577_v37 = vadd.f32 %v4340_v7, %v576_v35  ;;  %v3595_v38 = vpop.f32.mrb[6].mxu0  ;;  %v4420_v35 = vpop.permute.xlu0 %973  ;;  %3732 = vmatprep.subr.bf16.mxu1 %v5719_v2  ;;  %2692 = vmatprep.subr.bf16.mxu0 %v5719_v2 }
 0x101   : > { %1296 = vst.msk [vmem:[#allocation2 + $0x4] sm:$0xf] %vm1294_vm14, %v3455_v33  ;;  %v740_v39 = vmax.f32 %v585_v34, 0.0  ;;  %v588_v40 = vadd.f32 %v3595_v38, %v4340_v7  ;;  %v579_v41 = vpop.f32.mrb[7].mxu0 }
 0x102   : > { %v738_v42 = vmax.f32 %v577_v37, 0.0  ;;  %v580_v43 = vadd.f32 %v4340_v7, %v579_v41 }
 0x103   : > { %v1084_v44 = vsel %vm1041_vm1, %v740_v39, 0.0  ;;  %v741_v45 = vmax.f32 %v588_v40, 0.0  ;;  %vm1051_vm1 = vcmp.eq.s32.totalorder %v4312_v62, 1 }
 0x104   : > { %v3460_v48 = vpack.c.bf16 %v1084_v44, %v1084_v44  ;;  %v1082_v59 = vsel %vm1039_vm2, %v738_v42, 0.0  ;;  %v739_v47 = vmax.f32 %v580_v43, 0.0  ;;  %vm1054_vm2 = vcmp.eq.s32.totalorder %v4328_v4, 1 }
 0x105   : > { %v3458_v61 = vpack.c.bf16 %v1082_v59, %v1082_v59  ;;  %v1085_v0 = vsel %vm1042_vm3, %v741_v45, 0.0  ;;  %v1341_v49 = vld [vmem:[#allocation2 + $0x8] sm:$0xf]  ;;  %vm1052_vm3 = vcmp.eq.s32.totalorder %v4314_v63, 1 }
 0x106   : > { %1301 = vst.msk [vmem:[#allocation2 + $0x18] sm:$0xf] %vm1294_vm14, %v3460_v48  ;;  %v3461_v52 = vpack.c.bf16 %v1085_v0, %v1085_v0  ;;  %v1083_v3 = vsel %vm1040_vm4, %v739_v47, 0.0  ;;  %v3598_v5 = vpop.f32.mrb[8].mxu0  ;;  %v1376_v12 = vld [vmem:[#allocation2] sm:$0xe] }
 0x107   : > { %1299 = vst.msk [vmem:[#allocation2 + $0x10] sm:$0xf] %vm1294_vm14, %v3458_v61  ;;  %v3459_v53 = vpack.c.bf16 %v1083_v3, %v1083_v3  ;;  %v601_v9 = vadd.f32 %v3598_v5, %v4340_v7  ;;  %v592_v10 = vpop.f32.mrb[9].mxu0  ;;  %v4389_v11 = vld [vmem:[#allocation2 + $0xc] sm:$0xf]  ;;  %vm1053_vm4 = vcmp.eq.s32.totalorder %v4321_v1, 1 }
 0x108   : > { %1302 = vst.msk [vmem:[#allocation2 + $0x1c] sm:$0xf] %vm1294_vm14, %v3461_v52  ;;  %v593_v14 = vadd.f32 %v4340_v7, %v592_v10  ;;  %v3599_v15 = vpop.f32.mrb[10].mxu0  ;;  %v1340_v16 = vld [vmem:[#allocation2 + $0x4] sm:$0xf]  ;;  %v4398_v17 = vcombine.low %v1341_v49, %v4389_v11  ;;  %v4444_v52 = vpop.permute.xlu1 %976  ;;  %v3854_v10 = vld [vmem:[%s5715_s4 + $0x58] sm:$0xff]  }
 0x109   : > { %v1339_v18 = vld [vmem:[#allocation2] sm:$0xf]  ;;  %1300 = vst.msk [vmem:[#allocation2 + $0x14] sm:$0xf] %vm1294_vm14, %v3459_v53  ;;  %v744_v19 = vmax.f32 %v601_v9, 0.0  ;;  %v604_v20 = vadd.f32 %v3599_v15, %v4340_v7  ;;  %v595_v21 = vpop.f32.mrb[11].mxu0  ;;  %v3402_v22 = vcombine.low %v1376_v12, %v1340_v16  ;;  %3748 = vmatpush1.bf16.msra.mxu1 %v3854_v10  ;;  %2693 = vmatpush1.bf16.msra.mxu0 %v3854_v10 }
 0x10a   : > { %v4402_v23 = vcombine.low %v1339_v18, %v1340_v16  ;;  %v742_v24 = vmax.f32 %v593_v14, 0.0  ;;  %v596_v25 = vadd.f32 %v4340_v7, %v595_v21  ;;  %v1672_v26 = vrot.slane %v4398_v17, 1  ;;  %v1377_v46 = vld [vmem:[#allocation2 + $0x8] sm:$0xe]  ;;  %v4464_v16 = vpop.permute.xlu0 %979  ;;  %3733 = vmatprep.subr.bf16.mxu1 %v5719_v2  ;;  %2694 = vmatprep.subr.bf16.mxu0 %v5719_v2 }
 0x10b   : > { %v1088_v27 = vsel %vm1045_vm11, %v744_v19, 0.0  ;;  %v745_v28 = vmax.f32 %v604_v20, 0.0  ;;  %v1671_v29 = vrot.slane %v3402_v22, 1  ;;  %v1491_v30 = vshll.u32 %v4398_v17, 16  ;;  %v3855_v22 = vld [vmem:[%s5715_s4 + $0x60] sm:$0xff]  }
 0x10c   : > { %v3464_v31 = vpack.c.bf16 %v1088_v27, %v1088_v27  ;;  %v1086_v32 = vsel %vm1043_vm7, %v742_v24, 0.0  ;;  %v743_v33 = vmax.f32 %v596_v25, 0.0  ;;  %v1486_v34 = vshll.u32 %v4402_v23, 16 }
 0x10d   : > { %v3462_v36 = vpack.c.bf16 %v1086_v32, %v1086_v32  ;;  %v1089_v37 = vsel %vm1046_vm10, %v745_v28, 0.0  ;;  %v1673_v38 = vsel %vm1670_vm5, %v1671_v29, %v1672_v26  ;;  %v1484_v41 = vshrl.u32 %v4402_v23, 16  ;;  %v4495_v32 = vpop.permute.xlu1 %982  ;;  %3749 = vmatpush1.bf16.msra.mxu1 %v3855_v22  ;;  %2695 = vmatpush1.bf16.msra.mxu0 %v3855_v22 }
 0x10e   : > { %1305 = vst.msk [vmem:[#allocation2 + $0x28] sm:$0xf] %vm1294_vm14, %v3464_v31  ;;  %v3465_v50 = vpack.c.bf16 %v1089_v37, %v1089_v37  ;;  %v1087_v39 = vsel %vm1044_vm6, %v743_v33, 0.0  ;;  %v3602_v40 = vpop.f32.mrb[12].mxu0  ;;  %1708 = vrot.lane.b32.xlu0 %v1673_v38, %s3952_s22  ;;  %v1488_v55 = vrot.slane %v1486_v34, 1  ;;  %v4440_v47 = vrot.slane %v1491_v30, 1  ;;  %3734 = vmatprep.subr.bf16.mxu1 %v5719_v2 }
 0x10f   : > { %1303 = vst.msk [vmem:[#allocation2 + $0x20] sm:$0xf] %vm1294_vm14, %v3462_v36  ;;  %v3463_v42 = vpack.c.bf16 %v1087_v39, %v1087_v39  ;;  %v617_v43 = vadd.f32 %v3602_v40, %v4340_v7  ;;  %v608_v44 = vpop.f32.mrb[13].mxu0  ;;  %v4435_v45 = vld [vmem:[#allocation2 + $0x18] sm:$0xff]   ;;  %v1343_v61 = vld [vmem:[#allocation2 + $0x10] sm:$0xf]  ;;  %v4452_v9 = vcombine.low %v1377_v46, %v4389_v11  ;;  %2696 = vmatprep.subr.bf16.mxu0 %v5719_v2 }
 0x110   : > { %1306 = vst.msk [vmem:[#allocation2 + $0x2c] sm:$0xf] %vm1294_vm14, %v3465_v50  ;;  %v609_v51 = vadd.f32 %v4340_v7, %v608_v44  ;;  %v3603_v48 = vpop.f32.mrb[14].mxu0  ;;  %v1489_v59 = vor.u32 %v1488_v55, %v1484_v41  ;;  %v4442_v0 = vld [vmem:[#allocation2 + $0x14] sm:$0xf]  ;;  %v4461_v15 = vrot.slane %v4435_v45, 2  ;;  %v4510_v41 = vpop.permute.xlu0 %985 }
 0x111   : > { %1304 = vst.msk [vmem:[#allocation2 + $0x24] sm:$0xf] %vm1294_vm14, %v3463_v42  ;;  %v748_v3 = vmax.f32 %v617_v43, 0.0  ;;  %v620_v5 = vadd.f32 %v3603_v48, %v4340_v7  ;;  %v611_v49 = vpop.f32.mrb[15].mxu0  ;;  %v4449_v53 = vcombine.low %v1343_v61, %v4442_v0  ;;  %v1382_v30 = vld [vmem:[#allocation2 + $0x8] sm:$0xc] }
 0x112   : > { %v746_v12 = vmax.f32 %v609_v51, 0.0  ;;  %v612_v13 = vadd.f32 %v4340_v7, %v611_v49  ;;  %v1494_v14 = vsel %vm1482_vm8, %v1489_v59, %v4440_v47  ;;  %v1676_v37 = vrot.slane %v4435_v45, 1  ;;  %v3856_v38 = vld [vmem:[%s5715_s4 + $0x68] sm:$0xff]   ;;  %v1383_v40 = vld [vmem:[#allocation2 + $0x10] sm:$0xc] }
 0x113   : > { %v1092_v18 = vsel %vm1049_vm0, %v748_v3, 0.0  ;;  %v749_v19 = vmax.f32 %v620_v5, 0.0  ;;  %1631 = vrot.lane.b32.xlu0 %v1494_v14, %s3953_s8  ;;  %v1674_v20 = vrot.slane %v4449_v53, 1  ;;  %v1896_v21 = vrot.slane %v4449_v53, 2  ;;  %3750 = vmatpush1.bf16.msra.mxu1 %v3856_v38 }
 0x114   : > { %v3468_v24 = vpack.c.bf16 %v1092_v18, %v1092_v18  ;;  %v1090_v58 = vsel %vm1047_vm9, %v746_v12, 0.0  ;;  %v747_v25 = vmax.f32 %v612_v13, 0.0  ;;  %v1755_v57 = vrot.slane %v4452_v9, 1  ;;  %v3857_v12 = vld [vmem:[%s5715_s4 + $0x70] sm:$0xff]   ;;  %3735 = vmatprep.subr.bf16.mxu1 %v5719_v2  ;;  %2697 = vmatpush1.bf16.msra.mxu0 %v3856_v38 }
 0x115   : > { %v3466_v27 = vpack.c.bf16 %v1090_v58, %v1090_v58  ;;  %v1093_v28 = vsel %vm1050_vm13, %v749_v19, 0.0  ;;  %v1675_v29 = vsel %vm1670_vm5, %v1672_v26, %v1674_v20  ;;  %v1899_v56 = vsel %vm1894_vm12, %v1896_v21, %v4461_v15  ;;  %v4542_v19 = vpop.permute.xlu1 %988  ;;  %2698 = vmatprep.subr.bf16.mxu0 %v5719_v2 }
 0x116   : > { %1309 = vst.msk [vmem:[#allocation2 + $0x38] sm:$0xf] %vm1294_vm14, %v3468_v24  ;;  %v3469_v54 = vpack.c.bf16 %v1093_v28, %v1093_v28  ;;  %v1091_v60 = vsel %vm1048_vm15, %v747_v25, 0.0  ;;  %v3606_v31 = vpop.f32.mrb[16].mxu0  ;;  %1710 = vrot.lane.b32.xlu1 %v1675_v29, %s3952_s22  ;;  %v3407_v26 = vcombine.low %v1382_v30, %v4389_v11  ;;  %v1677_v44 = vsel %vm1670_vm5, %v1674_v20, %v1676_v37  ;;  %v4558_v29 = vpop.permute.xlu0 %991 }
 0x117   : > { %1307 = vst.msk [vmem:[#allocation2 + $0x30] sm:$0xf] %vm1294_vm14, %v3466_v27  ;;  %v3467_v33 = vpack.c.bf16 %v1091_v60, %v1091_v60  ;;  %v633_v34 = vadd.f32 %v3606_v31, %v4340_v7  ;;  %1934 = vrot.lane.b32.xlu0 %v1899_v56, %s3953_s8  ;;  %v624_v36 = vpop.f32.mrb[17].mxu0  ;;  %v4518_v46 = vcombine.low %v1383_v40, %v4442_v0  ;;  %v4525_v3 = vld [vmem:[#allocation2 + $0x28] sm:$0xff]   ;;  %vm1055_vm6 = vcmp.eq.s32.totalorder %v4335_v6, 1 }
 0x118   : > { %1310 = vst.msk [vmem:[#allocation2 + $0x3c] sm:$0xf] %vm1294_vm14, %v3469_v54  ;;  %v625_v11 = vadd.f32 %v4340_v7, %v624_v36  ;;  %v3607_v50 = vpop.f32.mrb[18].mxu0  ;;  %v4507_v39 = vld [vmem:[#allocation2 + $0x20] sm:$0xff]   ;;  %v1756_v59 = vsel %vm1670_vm5, %v1755_v57, %v1674_v20  ;;  %v1895_v49 = vrot.slane %v3407_v26, 2  ;;  %v1495_v10 = vshrl.u32 %v4398_v17, 16  ;;  %3751 = vmatpush1.bf16.msra.mxu1 %v3857_v12  ;;  %2699 = vmatpush1.bf16.msra.mxu0 %v3857_v12 }
 0x119   : > { %1308 = vst.msk [vmem:[#allocation2 + $0x34] sm:$0xf] %vm1294_vm14, %v3467_v33  ;;  %v752_v55 = vmax.f32 %v633_v34, 0.0  ;;  %v636_v42 = vadd.f32 %v3607_v50, %v4340_v7  ;;  %v627_v43 = vpop.f32.mrb[19].mxu0  ;;  %v1900_v61 = vrot.slane %v4507_v39, 2  ;;  %vm1058_vm7 = vcmp.eq.s32.totalorder %v4444_v52, 1  ;;  %3736 = vmatprep.subr.bf16.mxu1 %v5719_v2  ;;  %2700 = vmatprep.subr.bf16.mxu0 %v5719_v2 }
 0x11a   : > { %v750_v51 = vmax.f32 %v625_v11, 0.0  ;;  %v628_v48 = vadd.f32 %v4340_v7, %v627_v43  ;;  %1763 = vrot.lane.b32.xlu1 %v1677_v44, %s3954_s16  ;;  %vm1056_vm10 = vcmp.eq.s32.totalorder %v4342_v8, 1  ;;  %v1979_v24 = vrot.slane %v4518_v46, 2  ;;  %v3859_v11 = vld [vmem:[%s5715_s4 + $0x78] sm:$0xff]  }
 0x11b   : > { %v1096_v0 = vsel %vm1053_vm4, %v752_v55, 0.0  ;;  %v753_v5 = vmax.f32 %v636_v42, 0.0  ;;  %1761 = vrot.lane.b32.xlu0 %v1756_v59, %s3954_s16  ;;  %v1901_v1 = vsel %vm1894_vm12, %v4461_v15, %v1900_v61  ;;  %v1499_v62 = vshll.u32 %v4449_v53, 16  ;;  %v4594_v42 = vpop.permute.xlu1 %994 }
 0x11c   : > { %v3472_v13 = vpack.c.bf16 %v1096_v0, %v1096_v0  ;;  %v1094_v14 = vsel %vm1051_vm1, %v750_v51, 0.0  ;;  %v751_v18 = vmax.f32 %v628_v48, 0.0  ;;  %v1897_v4 = vsel %vm1894_vm12, %v1895_v49, %v1896_v21  ;;  %3752 = vmatpush1.bf16.msra.mxu1 %v3859_v11  ;;  %2701 = vmatpush1.bf16.msra.mxu0 %v3859_v11 }
 0x11d   : > { %v3470_v20 = vpack.c.bf16 %v1094_v14, %v1094_v14  ;;  %v1097_v22 = vsel %vm1054_vm2, %v753_v5, 0.0  ;;  %v1902_v28 = vrot.slane %v4525_v3, 2  ;;  %vm1057_vm11 = vcmp.eq.s32.totalorder %v4420_v35, 1  ;;  %v4607_v35 = vpop.permute.xlu0 %997 }
 0x11e   : > { %1313 = vst.msk [vmem:[#allocation2 + $0x48] sm:$0xf] %vm1294_vm14, %v3472_v13  ;;  %v3473_v58 = vpack.c.bf16 %v1097_v22, %v1097_v22  ;;  %v1095_v25 = vsel %vm1052_vm3, %v751_v18, 0.0  ;;  %v3610_v27 = vpop.f32.mrb[20].mxu0  ;;  %1712 = vrot.lane.b32.xlu1 %v1677_v44, %s3952_s22  ;;  %v1497_v54 = vor.u32 %v1495_v10, %v4440_v47  ;;  %v1503_v31 = vshrl.u32 %v4449_v53, 16 }
 0x11f   : > { %1311 = vst.msk [vmem:[#allocation2 + $0x40] sm:$0xf] %vm1294_vm14, %v3470_v20  ;;  %v3471_v56 = vpack.c.bf16 %v1095_v25, %v1095_v25  ;;  %v649_v30 = vadd.f32 %v3610_v27, %v4340_v7  ;;  %1987 = vrot.lane.b32.xlu0 %v1901_v1, %s3952_s22  ;;  %v640_v63 = vpop.f32.mrb[21].mxu0  ;;  %v4568_v26 = vshll.u32 %v4507_v39, 16  ;;  %v4571_v33 = vshrl.u32 %v4507_v39, 16 }
 0x120   : > { %1314 = vst.msk [vmem:[#allocation2 + $0x4c] sm:$0xf] %vm1294_vm14, %v3473_v58  ;;  %v641_v21 = vadd.f32 %v4340_v7, %v640_v63  ;;  %v3611_v60 = vpop.f32.mrb[22].mxu0  ;;  %v1980_v57 = vsel %vm1894_vm12, %v1979_v24, %v4461_v15  ;;  %v1501_v38 = vrot.slane %v1499_v62, 1  ;;  %vm1061_vm9 = vcmp.eq.s32.totalorder %v4510_v41, 1 }
 0x121   : > { %1312 = vst.msk [vmem:[#allocation2 + $0x44] sm:$0xf] %vm1294_vm14, %v3471_v56  ;;  %v756_v47 = vmax.f32 %v649_v30, 0.0  ;;  %v652_v34 = vadd.f32 %v3611_v60, %v4340_v7  ;;  %v643_v36 = vpop.f32.mrb[23].mxu0  ;;  %v1903_v15 = vsel %vm1894_vm12, %v1900_v61, %v1902_v28  ;;  %v4591_v55 = vshll.u32 %v4435_v45, 16  ;;  %v4633_v30 = vpop.permute.xlu1 %1000 }
 0x122   : > { %v754_v50 = vmax.f32 %v641_v21, 0.0  ;;  %v644_v40 = vadd.f32 %v4340_v7, %v643_v36  ;;  %1932 = vrot.lane.b32.xlu1 %v1897_v4, %s3953_s8  ;;  %vm1059_vm13 = vcmp.eq.s32.totalorder %v4464_v16, 1  ;;  %v4600_v51 = vshrl.u32 %v4435_v45, 16 }
 0x123   : > { %v1100_v43 = vsel %vm1057_vm11, %v756_v47, 0.0  ;;  %v757_v44 = vmax.f32 %v652_v34, 0.0  ;;  %1936 = vrot.lane.b32.xlu0 %v1901_v1, %s3953_s8  ;;  %v2037_v48 = vrot.slane %v4571_v33, 2  ;;  %v2038_v5 = vrot.slane %v4568_v26, 3  ;;  %v4640_v34 = vld [vmem:[%s5715_s4 + $0x80] sm:$0xff]  }
 0x124   : > { %v3476_v59 = vpack.c.bf16 %v1100_v43, %v1100_v43  ;;  %v1098_v61 = vsel %vm1055_vm6, %v754_v50, 0.0  ;;  %v755_v0 = vmax.f32 %v644_v40, 0.0  ;;  %vm1060_vm15 = vcmp.eq.s32.totalorder %v4495_v32, 1  ;;  %v4647_v50 = vpop.permute.xlu0 %1003  ;;  %3632 = vmatprep.subr.bf16.mxu0 %v4640_v34 }
 0x125   : > { %v3474_v49 = vpack.c.bf16 %v1098_v61, %v1098_v61  ;;  %v1101_v10 = vsel %vm1058_vm7, %v757_v44, 0.0  ;;  %vm2024_vm0 = vsmask.f32 5376  ;;  %v2026_v12 = vshrl.u32 %v4518_v46, 16 }
 0x126   : > { %v2029_v13 = vshll.u32 %v4518_v46, 16  ;;  %1317 = vst.msk [vmem:[#allocation2 + $0x58] sm:$0xf] %vm1294_vm14, %v3476_v59  ;;  %v3477_v6 = vpack.c.bf16 %v1101_v10, %v1101_v10  ;;  %v1099_v14 = vsel %vm1056_vm10, %v755_v0, 0.0  ;;  %v3614_v18 = vpop.f32.mrb[24].mxu0  ;;  %1985 = vrot.lane.b32.xlu1 %v1980_v57, %s3952_s22  ;;  %v1502_v1 = vsel %vm1482_vm8, %v1497_v54, %v1501_v38 }
 0x127   : > { %v4619_v20 = vshll.u32 %v4525_v3, 16  ;;  %1315 = vst.msk [vmem:[#allocation2 + $0x50] sm:$0xf] %vm1294_vm14, %v3474_v49  ;;  %v3475_v52 = vpack.c.bf16 %v1099_v14, %v1099_v14  ;;  %v665_v22 = vadd.f32 %v3614_v18, %v4340_v7  ;;  %1989 = vrot.lane.b32.xlu0 %v1903_v15, %s3952_s22  ;;  %v656_v46 = vpop.f32.mrb[25].mxu0  ;;  %v1505_v8 = vor.u32 %v1503_v31, %v1501_v38  ;;  %v4668_v14 = vpop.permute.xlu1 %1006 }
 0x128   : > { %v4627_v24 = vshrl.u32 %v4525_v3, 16  ;;  %1318 = vst.msk [vmem:[#allocation2 + $0x5c] sm:$0xf] %vm1294_vm14, %v3477_v6  ;;  %v657_v58 = vadd.f32 %v4340_v7, %v656_v46  ;;  %v3615_v25 = vpop.f32.mrb[26].mxu0  ;;  %v2033_v27 = vrot.slane %v4600_v51, 2  ;;  %v2034_v4 = vrot.slane %v4591_v55, 3  ;;  %v1010_v46 = vpop.permute.xlu0 %1009 }
 0x129   : > { %v2039_v56 = vor.u32 %v2038_v5, %v2037_v48  ;;  %1316 = vst.msk [vmem:[#allocation2 + $0x54] sm:$0xf] %vm1294_vm14, %v3475_v52  ;;  %v760_v63 = vmax.f32 %v665_v22, 0.0  ;;  %v668_v54 = vadd.f32 %v3615_v25, %v4340_v7  ;;  %v659_v21 = vpop.f32.mrb[27].mxu0  ;;  %v2028_v60 = vrot.slane %v2026_v12, 2  ;;  %v4666_v6 = vld [vmem:[#allocation2 + $0x30] sm:$0xff]  }
 0x12a   : > { %v2031_v47 = vrot.slane %v2029_v13, 3  ;;  %v758_v36 = vmax.f32 %v657_v58, 0.0  ;;  %v660_v57 = vadd.f32 %v4340_v7, %v659_v21  ;;  %1633 = vrot.lane.b32.xlu1 %v1502_v1, %s3953_s8  ;;  %v2041_v38 = vrot.slane %v4627_v24, 2 }
 0x12b   : > { %v2042_v11 = vrot.slane %v4619_v20, 3  ;;  %vm1062_vm1 = vcmp.eq.s32.totalorder %v4542_v19, 1  ;;  %v1104_v40 = vsel %vm1061_vm9, %v760_v63, 0.0  ;;  %v761_v43 = vmax.f32 %v668_v54, 0.0  ;;  %1938 = vrot.lane.b32.xlu0 %v1903_v15, %s3953_s8 }
 0x12c   : > { %v1509_v44 = vrot.slane %v4591_v55, 1  ;;  %v3480_v48 = vpack.c.bf16 %v1104_v40, %v1104_v40  ;;  %v1102_v59 = vsel %vm1059_vm13, %v758_v36, 0.0  ;;  %v759_v61 = vmax.f32 %v660_v57, 0.0 }
 0x12d   : > { %v2035_v0 = vor.u32 %v2034_v4, %v2033_v27  ;;  %v3478_v5 = vpack.c.bf16 %v1102_v59, %v1102_v59  ;;  %v1105_v19 = vsel %vm1062_vm1, %v761_v43, 0.0  ;;  %v2032_v49 = vor.u32 %v2031_v47, %v2028_v60 }
 0x12e   : > { %v1510_v41 = vsel %vm1482_vm8, %v1505_v8, %v1509_v44  ;;  %1321 = vst.msk [vmem:[#allocation2 + $0x68] sm:$0xf] %vm1294_vm14, %v3480_v48  ;;  %v3481_v15 = vpack.c.bf16 %v1105_v19, %v1105_v19  ;;  %v1103_v10 = vsel %vm1060_vm15, %v759_v61, 0.0  ;;  %v3618_v12 = vpop.f32.mrb[28].mxu0  ;;  %v4664_v13 = vor.u32 %v2042_v11, %v2041_v38  ;;  %v4690_v11 = vld [vmem:[#allocation2 + $0x38] sm:$0xff]   ;;  %v4701_v61 = vpop.permute.xlu0 %1015 }
 0x12f   : > { %1635 = vrot.lane.b32.xlu1 %v1510_v41, %s3953_s8  ;;  %v2040_v16 = vsel %vm2024_vm0, %v2035_v0, %v2039_v56  ;;  %1319 = vst.msk [vmem:[#allocation2 + $0x60] sm:$0xf] %vm1294_vm14, %v3478_v5  ;;  %v3479_v18 = vpack.c.bf16 %v1103_v10, %v1103_v10  ;;  %v681_v1 = vadd.f32 %v3618_v12, %v4340_v7  ;;  %v672_v32 = vpop.f32.mrb[29].mxu0  ;;  %vm1065_vm2 = vcmp.eq.s32.totalorder %v4607_v35, 1 }
 0x130   : > { %2117 = vrot.lane.b32.xlu0 %v2040_v16, %s3954_s16  ;;  %1322 = vst.msk [vmem:[#allocation2 + $0x6c] sm:$0xf] %vm1294_vm14, %v3481_v15  ;;  %v673_v52 = vadd.f32 %v4340_v7, %v672_v32  ;;  %v3619_v22 = vpop.f32.mrb[30].mxu0  ;;  %v2036_v27 = vsel %vm2024_vm0, %v2032_v49, %v2035_v0  ;;  %v1678_v4 = vrot.slane %v4507_v39, 1  ;;  %v2044_v21 = vsel %vm2024_vm0, %v2039_v56, %v4664_v13  ;;  %v1013_v56 = vpop.permute.xlu1 %1012 }
 0x131   : > { %1320 = vst.msk [vmem:[#allocation2 + $0x64] sm:$0xf] %vm1294_vm14, %v3479_v18  ;;  %v764_v8 = vmax.f32 %v681_v1, 0.0  ;;  %v684_v58 = vadd.f32 %v3619_v22, %v4340_v7  ;;  %v675_v25 = vpop.f32.mrb[31].mxu0  ;;  %v1904_v60 = vrot.slane %v4666_v6, 2  ;;  %vm1063_vm3 = vcmp.eq.s32.totalorder %v4558_v29, 1 }
 0x132   : > { %v762_v63 = vmax.f32 %v673_v52, 0.0  ;;  %v676_v54 = vadd.f32 %v4340_v7, %v675_v25  ;;  %vm1066_vm4 = vcmp.eq.s32.totalorder %v4633_v30, 1  ;;  %vm1064_vm6 = vcmp.eq.s32.totalorder %v4594_v42, 1 }
 0x133   : > { %2115 = vrot.lane.b32.xlu1 %v2036_v27, %s3954_s16  ;;  %v1108_v47 = vsel %vm1065_vm2, %v764_v8, 0.0  ;;  %v765_v36 = vmax.f32 %v684_v58, 0.0  ;;  %v1679_v29 = vsel %vm1670_vm5, %v1676_v37, %v1678_v4  ;;  %v1905_v30 = vsel %vm1894_vm12, %v1902_v28, %v1904_v60 }
 0x134   : > { %2119 = vrot.lane.b32.xlu0 %v2044_v21, %s3954_s16  ;;  %v3484_v39 = vpack.c.bf16 %v1108_v47, %v1108_v47  ;;  %v1106_v57 = vsel %vm1063_vm3, %v762_v63, 0.0  ;;  %v763_v38 = vmax.f32 %v676_v54, 0.0  ;;  %v1680_v0 = vrot.slane %v4525_v3, 1  ;;  %v1019_v1 = vpop.permute.xlu1 %1018 }
 0x135   : > { %v3482_v40 = vpack.c.bf16 %v1106_v57, %v1106_v57  ;;  %v1109_v43 = vsel %vm1066_vm4, %v765_v36, 0.0  ;;  %vm1068_vm7 = vcmp.eq.s32.totalorder %v4668_v14, 1  ;;  %v1906_v28 = vrot.slane %v4690_v11, 2 }
 0x136   : > { %1325 = vst.msk [vmem:[#allocation2 + $0x78] sm:$0xf] %vm1294_vm14, %v3484_v39  ;;  %v3485_v35 = vpack.c.bf16 %v1109_v43, %v1109_v43  ;;  %v1107_v48 = vsel %vm1064_vm6, %v763_v38, 0.0  ;;  %v3622_v59 = vpop.f32.mrb[32].mxu0  ;;  %v4714_v10 = vshll.u32 %v4666_v6, 16  ;;  %v4717_v12 = vshrl.u32 %v4666_v6, 16 }
 0x137   : > { %1765 = vrot.lane.b32.xlu1 %v1679_v29, %s3954_s16  ;;  %1323 = vst.msk [vmem:[#allocation2 + $0x70] sm:$0xf] %vm1294_vm14, %v3482_v40  ;;  %v3483_v42 = vpack.c.bf16 %v1107_v48, %v1107_v48  ;;  %v697_v45 = vadd.f32 %v3622_v59, %v4340_v7  ;;  %v688_v37 = vpop.f32.mrb[33].mxu0  ;;  %vm1067_vm10 = vcmp.eq.s32.totalorder %v4647_v50, 1  ;;  %vm1069_vm11 = vcmp.eq.s32.totalorder %v1010_v46, 1  ;;  %v1022_v46 = vpop.permute.xlu0 %1021 }
 0x138   : > { %1991 = vrot.lane.b32.xlu0 %v1905_v30, %s3952_s22  ;;  %1326 = vst.msk [vmem:[#allocation2 + $0x7c] sm:$0xf] %vm1294_vm14, %v3485_v35  ;;  %v689_v5 = vadd.f32 %v4340_v7, %v688_v37  ;;  %v3623_v19 = vpop.f32.mrb[34].mxu0  ;;  %vm1070_vm9 = vcmp.eq.s32.totalorder %v1013_v56, 1  ;;  %v1681_v22 = vsel %vm1670_vm5, %v1678_v4, %v1680_v0  ;;  %v1907_v50 = vsel %vm1894_vm12, %v1904_v60, %v1906_v28  ;;  %v1025_v43 = vpop.permute.xlu1 %1024 }
 0x139   : > { %1324 = vst.msk [vmem:[#allocation2 + $0x74] sm:$0xf] %vm1294_vm14, %v3483_v42  ;;  %v768_v41 = vmax.f32 %v697_v45, 0.0  ;;  %v700_v49 = vadd.f32 %v3623_v19, %v4340_v7  ;;  %v691_v15 = vpop.f32.mrb[35].mxu0  ;;  %v2045_v54 = vrot.slane %v4717_v12, 2  ;;  %v2046_v21 = vrot.slane %v4714_v10, 3 }
 0x13a   : > { %v766_v16 = vmax.f32 %v689_v5, 0.0  ;;  %v692_v18 = vadd.f32 %v4340_v7, %v691_v15  ;;  %v4736_v39 = vshll.u32 %v4690_v11, 16  ;;  %v4739_v60 = vshrl.u32 %v4690_v11, 16 }
 0x13b   : > { %1714 = vrot.lane.b32.xlu1 %v1679_v29, %s3952_s22  ;;  %v1112_v32 = vsel %vm1069_vm11, %v768_v41, 0.0  ;;  %v769_v52 = vmax.f32 %v700_v49, 0.0  ;;  %vm1072_vm13 = vcmp.eq.s32.totalorder %v1019_v1, 1  ;;  %vm1073_vm15 = vcmp.eq.s32.totalorder %v1022_v46, 1  ;;  %v1028_v1 = vpop.permute.xlu0 %1027 }
 0x13c   : > { %1940 = vrot.lane.b32.xlu0 %v1905_v30, %s3953_s8  ;;  %v3488_v8 = vpack.c.bf16 %v1112_v32, %v1112_v32  ;;  %v1110_v58 = vsel %vm1067_vm10, %v766_v16, 0.0  ;;  %v767_v25 = vmax.f32 %v692_v18, 0.0  ;;  %v1517_v59 = vrot.slane %v4568_v26, 1 }
 0x13d   : > { %v3486_v27 = vpack.c.bf16 %v1110_v58, %v1110_v58  ;;  %v1113_v63 = vsel %vm1070_vm9, %v769_v52, 0.0  ;;  %v2047_v30 = vor.u32 %v2046_v21, %v2045_v54  ;;  %v2049_v37 = vrot.slane %v4739_v60, 2  ;;  %v3872_v54 = vld [vmem:[%s5713_s2] ss:$0 sm:$0xff] }
 0x13e   : > { %1329 = vst.msk [vmem:[#allocation2 + $0x88] sm:$0xf] %vm1294_vm14, %v3488_v8  ;;  %v3489_v47 = vpack.c.bf16 %v1113_v63, %v1113_v63  ;;  %v1111_v4 = vsel %vm1068_vm7, %v767_v25, 0.0  ;;  %v3626_v36 = vpop.f32.mrb[36].mxu0  ;;  %v2050_v5 = vrot.slane %v4736_v39, 3  ;;  %vm1071_vm1 = vcmp.eq.s32.totalorder %v4701_v61, 1 }
 0x13f   : > { %1767 = vrot.lane.b32.xlu1 %v1681_v22, %s3954_s16  ;;  %1327 = vst.msk [vmem:[#allocation2 + $0x80] sm:$0xf] %vm1294_vm14, %v3486_v27  ;;  %v3487_v57 = vpack.c.bf16 %v1111_v4, %v1111_v4  ;;  %v713_v38 = vadd.f32 %v3626_v36, %v4340_v7  ;;  %v704_v56 = vpop.f32.mrb[37].mxu0  ;;  %v1513_v49 = vor.u32 %v4600_v51, %v1509_v44  ;;  %vm1074_vm2 = vcmp.eq.s32.totalorder %v1025_v43, 1 }
 0x140   : > { %1993 = vrot.lane.b32.xlu0 %v1907_v50, %s3952_s22  ;;  %1330 = vst.msk [vmem:[#allocation2 + $0x8c] sm:$0xf] %vm1294_vm14, %v3489_v47  ;;  %v705_v14 = vadd.f32 %v4340_v7, %v704_v56  ;;  %v3627_v40 = vpop.f32.mrb[38].mxu0  ;;  %v2048_v44 = vsel %vm2024_vm0, %v4664_v13, %v2047_v30  ;;  %v4766_v25 = vor.u32 %v2050_v5, %v2049_v37  ;;  %v1525_v63 = vrot.slane %v4619_v20, 1 }
 0x141   : > { %1328 = vst.msk [vmem:[#allocation2 + $0x84] sm:$0xf] %vm1294_vm14, %v3487_v57  ;;  %v772_v29 = vmax.f32 %v713_v38, 0.0  ;;  %v716_v35 = vadd.f32 %v3627_v40, %v4340_v7  ;;  %v707_v48 = vpop.f32.mrb[39].mxu0  ;;  %v1518_v52 = vsel %vm1482_vm8, %v1513_v49, %v1517_v59  ;;  %v1682_v47 = vrot.slane %v4666_v6, 1 }
 0x142   : > { %v770_v42 = vmax.f32 %v705_v14, 0.0  ;;  %v708_v45 = vadd.f32 %v4340_v7, %v707_v48  ;;  %v2052_v57 = vsel %vm2024_vm0, %v2047_v30, %v4766_v25  ;;  %vm1075_vm3 = vcmp.eq.s32.totalorder %v1028_v1, 1  ;;  %v4796_v48 = vld [vmem:[#allocation2 + $0x48] sm:$0xff]  }
 0x143   : > { %1716 = vrot.lane.b32.xlu1 %v1681_v22, %s3952_s22  ;;  %v1116_v19 = vsel %vm1073_vm15, %v772_v29, 0.0  ;;  %v773_v41 = vmax.f32 %v716_v35, 0.0  ;;  %v1521_v22 = vor.u32 %v4571_v33, %v1517_v59  ;;  %v1810_v56 = vrot.slane %v1499_v62, 2 }
 0x144   : > { %1942 = vrot.lane.b32.xlu0 %v1907_v50, %s3953_s8  ;;  %v3492_v15 = vpack.c.bf16 %v1116_v19, %v1116_v19  ;;  %v1114_v7 = vsel %vm1071_vm1, %v770_v42, 0.0  ;;  %v771_v16 = vmax.f32 %v708_v45, 0.0  ;;  %v4768_v50 = vld [vmem:[#allocation2 + $0x40] sm:$0xff]   ;;  %v1809_v14 = vrot.slane %v1503_v31, 1 }
 0x145   : > { %v3490_v18 = vpack.c.bf16 %v1114_v7, %v1114_v7  ;;  %v1117_v32 = vsel %vm1074_vm2, %v773_v41, 0.0  ;;  %v1526_v21 = vsel %vm1482_vm8, %v1521_v22, %v1525_v63  ;;  %v1908_v38 = vrot.slane %v4768_v50, 2 }
 0x146   : > { %1333 = vst.msk [vmem:[#allocation2 + $0x98] sm:$0xf] %vm1294_vm14, %v3492_v15  ;;  %v3493_v61 = vpack.c.bf16 %v1117_v32, %v1117_v32  ;;  %v1115_v8 = vsel %vm1072_vm13, %v771_v16, 0.0  ;;  %v3630_v58 = vpop.f32.mrb[40].mxu0  ;;  %v1683_v29 = vsel %vm1670_vm5, %v1680_v0, %v1682_v47  ;;  %v4800_v62 = vor.u32 %v1810_v56, %v1809_v14 }
 0x147   : > { %1637 = vrot.lane.b32.xlu1 %v1518_v52, %s3953_s8  ;;  %1331 = vst.msk [vmem:[#allocation2 + $0x90] sm:$0xf] %vm1294_vm14, %v3490_v18  ;;  %v3491_v46 = vpack.c.bf16 %v1115_v8, %v1115_v8  ;;  %v720_v27 = vpop.f32.mrb[41].mxu0  ;;  %v1909_v35 = vsel %vm1894_vm12, %v1906_v28, %v1908_v38  ;;  %v1813_v31 = vrot.slane %v4600_v51, 1  ;;  %v1814_v3 = vrot.slane %v4591_v55, 2 }
 0x148   : > { %2121 = vrot.lane.b32.xlu0 %v2048_v44, %s3954_s16  ;;  %1334 = vst.msk [vmem:[#allocation2 + $0x9c] sm:$0xf] %vm1294_vm14, %v3493_v61  ;;  %v721_v13 = vadd.f32 %v3872_v54, %v720_v27  ;;  %v3631_v4 = vpop.f32.mrb[42].mxu0  ;;  %v1684_v0 = vrot.slane %v4690_v11, 1  ;;  %vm1800_vm4 = vsmask.f32 6400  ;;  %v1529_v18 = vor.u32 %v4627_v24, %v1525_v63 }
 0x149   : > { %1332 = vst.msk [vmem:[#allocation2 + $0x94] sm:$0xf] %vm1294_vm14, %v3491_v46  ;;  %v723_v59 = vpop.f32.mrb[43].mxu0  ;;  %v1910_v28 = vrot.slane %v4796_v48, 2  ;;  %v1815_v30 = vor.u32 %v1814_v3, %v1813_v31  ;;  %v1817_v42 = vrot.slane %v4571_v33, 1  ;;  %v1818_v55 = vrot.slane %v4568_v26, 2 }
 0x14a   : > { %v774_v36 = vmax.f32 %v721_v13, 0.0  ;;  %v1685_v51 = vsel %vm1670_vm5, %v1682_v47, %v1684_v0  ;;  %v1686_v5 = vrot.slane %v4768_v50, 1  ;;  %v1821_v19 = vrot.slane %v4627_v24, 1 }
 0x14b   : > { %1639 = vrot.lane.b32.xlu1 %v1526_v21, %s3953_s8  ;;  %v4811_v45 = vsel %vm1800_vm4, %v4800_v62, %v1815_v30  ;;  %v1911_v37 = vsel %vm1894_vm12, %v1908_v38, %v1910_v28  ;;  %v1819_v33 = vor.u32 %v1818_v55, %v1817_v42  ;;  %v1822_v41 = vrot.slane %v4619_v20, 2 }
 0x14c   : > { %2123 = vrot.lane.b32.xlu0 %v2052_v57, %s3954_s16  ;;  %v1118_v40 = vsel %vm1075_vm3, %v774_v36, 0.0  ;;  %v1533_v49 = vrot.slane %v4714_v10, 1  ;;  %v1687_v26 = vsel %vm1670_vm5, %v1684_v0, %v1686_v5  ;;  %v1688_v7 = vrot.slane %v4796_v48, 1  ;;  %v4858_v36 = vld [vmem:[#allocation2 + $0x50] sm:$0xff]   ;;  %v4874_v0 = vld [vmem:[#allocation2 + $0x58] sm:$0xff]  }
 0x14d   : > { %v3494_v43 = vpack.c.bf16 %v1118_v40, %v1118_v40  ;;  %v4825_v15 = vsel %vm1800_vm4, %v1815_v30, %v1819_v33  ;;  %v1823_v16 = vor.u32 %v1822_v41, %v1821_v19  ;;  %v1547_v22 = vshll.u32 %v4768_v50, 16 }
 0x14e   : > { %v1534_v20 = vsel %vm1482_vm8, %v1529_v18, %v1533_v49  ;;  %v1537_v52 = vor.u32 %v4717_v12, %v1533_v49  ;;  %v1689_v61 = vsel %vm1670_vm5, %v1686_v5, %v1688_v7  ;;  %v1551_v8 = vshrl.u32 %v4768_v50, 16  ;;  %v4896_v18 = vld [vmem:[#allocation2 + $0x60] sm:$0xff]  }
 0x14f   : > { %1769 = vrot.lane.b32.xlu1 %v1683_v29, %s3954_s16  ;;  %1335 = vst.msk [vmem:[#allocation2 + $0xa0] sm:$0xf] %vm1294_vm14, %v3494_v43  ;;  %v4833_v32 = vsel %vm1800_vm4, %v1819_v33, %v1823_v16  ;;  %v1825_v58 = vrot.slane %v4717_v12, 1  ;;  %v1826_v24 = vrot.slane %v4714_v10, 2  ;;  %v1541_v44 = vrot.slane %v4736_v39, 1 }
 0x150   : > { %1995 = vrot.lane.b32.xlu0 %v1909_v35, %s3952_s22  ;;  %v1549_v63 = vrot.slane %v1547_v22, 1  ;;  %v2054_v1 = vrot.slane %v1547_v22, 3  ;;  %v2053_v54 = vrot.slane %v1551_v8, 2  ;;  %v1555_v13 = vshll.u32 %v4796_v48, 16 }
 0x151   : > { %v1827_v46 = vor.u32 %v1826_v24, %v1825_v58  ;;  %v1542_v27 = vsel %vm1482_vm8, %v1537_v52, %v1541_v44  ;;  %v1559_v21 = vshrl.u32 %v4796_v48, 16  ;;  %v1829_v10 = vrot.slane %v4739_v60, 1 }
 0x152   : > { %v1830_v47 = vrot.slane %v4736_v39, 2  ;;  %v1545_v4 = vor.u32 %v4739_v60, %v1541_v44  ;;  %v2055_v56 = vor.u32 %v2054_v1, %v2053_v54  ;;  %v2058_v40 = vrot.slane %v1555_v13, 3  ;;  %v4913_v54 = vld [vmem:[#allocation2 + $0x70] sm:$0xff]  }
 0x153   : > { %1718 = vrot.lane.b32.xlu1 %v1683_v29, %s3952_s22  ;;  %v4852_v12 = vsel %vm1800_vm4, %v1823_v16, %v1827_v46  ;;  %v2057_v14 = vrot.slane %v1559_v21, 2  ;;  %v1912_v29 = vrot.slane %v4858_v36, 2  ;;  %v1833_v39 = vrot.slane %v1551_v8, 1 }
 0x154   : > { %1944 = vrot.lane.b32.xlu0 %v1909_v35, %s3953_s8  ;;  %v1831_v57 = vor.u32 %v1830_v47, %v1829_v10  ;;  %v1550_v38 = vsel %vm1482_vm8, %v1545_v4, %v1549_v63  ;;  %v1834_v35 = vrot.slane %v1547_v22, 2  ;;  %v2056_v60 = vsel %vm2024_vm0, %v4766_v25, %v2055_v56  ;;  %v4921_v4 = vld [vmem:[#allocation2 + $0x78] sm:$0xff]  }
 0x155   : > { %v2059_v31 = vor.u32 %v2058_v40, %v2057_v14  ;;  %v1913_v59 = vsel %vm1894_vm12, %v1910_v28, %v1912_v29  ;;  %v1557_v25 = vrot.slane %v1555_v13, 1  ;;  %v1914_v55 = vrot.slane %v4874_v0, 2  ;;  %v4932_v40 = vld [vmem:[#allocation2 + $0x80] sm:$0xff]  }
 0x156   : > { %v4864_v43 = vsel %vm1800_vm4, %v1827_v46, %v1831_v57  ;;  %v1835_v3 = vor.u32 %v1834_v35, %v1833_v39  ;;  %v1567_v5 = vshrl.u32 %v4858_v36, 16  ;;  %v1690_v19 = vrot.slane %v4858_v36, 1 }
 0x157   : > { %1771 = vrot.lane.b32.xlu1 %v1685_v51, %s3954_s16  ;;  %5726 = vst [vmem:[#allocation6_spill] sm:$0xff] %v4864_v43  ;;  %v2060_v42 = vsel %vm2024_vm0, %v2055_v56, %v2059_v31  ;;  %v4890_v33 = vshll.u32 %v4874_v0, 16  ;;  %v4893_v41 = vshrl.u32 %v4874_v0, 16  ;;  %v1915_v49 = vsel %vm1894_vm12, %v1912_v29, %v1914_v55  ;;  %v4934_v29 = vld [vmem:[#allocation2 + $0x88] sm:$0xff]  }
 0x158   : > { %1997 = vrot.lane.b32.xlu0 %v1911_v37, %s3952_s22  ;;  %v4877_v30 = vsel %vm1800_vm4, %v1831_v57, %v1835_v3  ;;  %v1837_v52 = vrot.slane %v1559_v21, 1  ;;  %v5721_v58 = vrot.slane %v4874_v0, 1  ;;  %v5722_v44 = vrot.slane %v4896_v18, 2 }
 0x159   : > { %5727 = vst [vmem:[#allocation7_spill] sm:$0xff] %v4877_v30  ;;  %v2065_v22 = vrot.slane %v4893_v41, 2  ;;  %v1561_v1 = vor.u32 %v1559_v21, %v1557_v25  ;;  %v1841_v10 = vrot.slane %v1567_v5, 1  ;;  %v4938_v39 = vshll.u32 %v4896_v18, 16 }
 0x15a   : > { %v1693_v47 = vsel %vm1670_vm5, %v1690_v19, %v5721_v58  ;;  %v4927_v56 = vsel %vm1894_vm12, %v1914_v55, %v5722_v44  ;;  %v4941_v35 = vshrl.u32 %v4896_v18, 16  ;;  %v5740_v30 = vrot.slane %v4896_v18, 2 }
 0x15b   : > { %1720 = vrot.lane.b32.xlu1 %v1685_v51, %s3952_s22  ;;  %v1553_v51 = vor.u32 %v1551_v8, %v1549_v63  ;;  %v1838_v8 = vrot.slane %v1555_v13, 2  ;;  %v4908_v63 = vld [vmem:[#allocation2 + $0x68] sm:$0xff]   ;;  %vm2192_vm14 = vcmask 261120   ;;  %vm2229_vm6 = vcmask 523264  }
 0x15c   : > { %1722 = vrot.lane.b32.xlu0 %v1687_v26, %s3952_s22  ;;  %vm2266_vm7 = vcmask 785408   ;;  %vm2154_vm10 = vcmask 1044480  }
 0x15d   : > { %v1558_v28 = vsel %vm1482_vm8, %v1553_v51, %v1557_v25  ;;  %v4955_v51 = vld [vmem:[#allocation2 + $0x90] sm:$0xff]   ;;  %v1845_v25 = vrot.slane %v4893_v41, 1 }
 0x15f   : > { %1641 = vrot.lane.b32.xlu1 %v1534_v20, %s3953_s8  ;;  %v1691_v20 = vsel %vm1670_vm5, %v1688_v7, %v1690_v19  ;;  %v1846_v19 = vrot.slane %v4890_v33, 2 }
 0x160   : > { %1775 = vrot.lane.b32.xlu0 %v1689_v61, %s3954_s16 }
 0x163   : > { %1643 = vrot.lane.b32.xlu1 %v1542_v27, %s3953_s8  ;;  %v1839_v27 = vor.u32 %v1838_v8, %v1837_v52  ;;  %v1847_v52 = vor.u32 %v1846_v19, %v1845_v25  ;;  %v5001_v19 = vld [vmem:[#allocation2 + $0x98] ss:$0 sps:$4 sm:$0x33]  }
 0x164   : > { %1724 = vrot.lane.b32.xlu0 %v1689_v61, %s3952_s22  ;;  %v2066_v61 = vrot.slane %v4890_v33, 3 }
 0x165   : > { %v4916_v13 = vsel %vm1800_vm4, %v1835_v3, %v1839_v27 }
 0x166   : > { %v4911_v7 = vor.u32 %v2066_v61, %v2065_v22  ;;  %5728 = vst [vmem:[#allocation8_spill] sm:$0xff] %v4916_v13  ;;  %v1849_v22 = vrot.slane %v4941_v35, 1  ;;  %v1850_v61 = vrot.slane %v4938_v39, 2 }
 0x167   : > { %1773 = vrot.lane.b32.xlu1 %v1687_v26, %s3954_s16  ;;  %v2061_v26 = vrot.slane %v1567_v5, 2 }
 0x168   : > { %1645 = vrot.lane.b32.xlu0 %v1550_v38, %s3953_s8 }
 0x16b   : > { %1946 = vrot.lane.b32.xlu1 %v1911_v37, %s3953_s8  ;;  %v1563_v37 = vshll.u32 %v4858_v36, 16 }
 0x16c   : > { %2125 = vrot.lane.b32.xlu0 %v2056_v60, %s3954_s16  ;;  %v4944_v60 = vshrl.u32 %v4908_v63, 16 }
 0x16d   : > { %v2062_v16 = vrot.slane %v1563_v37, 3  ;;  %v1565_v46 = vrot.slane %v1563_v37, 1  ;;  %v1842_v57 = vrot.slane %v1563_v37, 2  ;;  %v4961_v37 = vshll.u32 %v4913_v54, 16 }
 0x16e   : > { %v1853_v8 = vrot.slane %v4944_v60, 1 }
 0x16f   : > { %1999 = vrot.lane.b32.xlu1 %v1913_v59, %s3952_s22  ;;  %v2063_v24 = vor.u32 %v2062_v16, %v2061_v26  ;;  %v1566_v21 = vsel %vm1482_vm8, %v1561_v1, %v1565_v46  ;;  %v4930_v14 = vor.u32 %v1567_v5, %v1565_v46  ;;  %v4964_v5 = vshrl.u32 %v4921_v4, 16 }
 0x170   : > { %2127 = vrot.lane.b32.xlu0 %v2060_v42, %s3954_s16  ;;  %v4953_v42 = vshrl.u32 %v4913_v54, 16  ;;  %v4974_v26 = vshll.u32 %v4932_v40, 16  ;;  %v4977_v16 = vshrl.u32 %v4932_v40, 16 }
 0x171   : > { %v2064_v38 = vsel %vm2024_vm0, %v2059_v31, %v2063_v24  ;;  %v1843_v31 = vor.u32 %v1842_v57, %v1841_v10  ;;  %v2068_v3 = vsel %vm2024_vm0, %v2063_v24, %v4911_v7  ;;  %v4988_v24 = vshrl.u32 %v4934_v29, 16 }
 0x172   : > { %v1857_v1 = vrot.slane %v4953_v42, 1  ;;  %v1851_v57 = vor.u32 %v1850_v61, %v1849_v22  ;;  %v1865_v44 = vrot.slane %v4977_v16, 1  ;;  %v1866_v46 = vrot.slane %v4974_v26, 2 }
 0x173   : > { %1948 = vrot.lane.b32.xlu1 %v1913_v59, %s3953_s8  ;;  %v4950_v59 = vshll.u32 %v4908_v63, 16  ;;  %v4994_v10 = vsel %vm1800_vm4, %v1843_v31, %v1847_v52 }
 0x174   : > { %1647 = vrot.lane.b32.xlu0 %v1558_v28, %s3953_s8  ;;  %v4967_v28 = vsel %vm1800_vm4, %v1839_v27, %v1843_v31  ;;  %5730 = vst [vmem:[#allocation10_spill] sm:$0xff] %v4994_v10  ;;  %v5009_v22 = vsel %vm1800_vm4, %v1847_v52, %v1851_v57  ;;  %v1869_v10 = vrot.slane %v4988_v24, 1  ;;  %v1867_v52 = vor.u32 %v1866_v46, %v1865_v44 }
 0x175   : > { %5729 = vst [vmem:[#allocation9_spill] sm:$0xff] %v4967_v28  ;;  %v1854_v27 = vrot.slane %v4950_v59, 2  ;;  %5731 = vst [vmem:[#allocation11_spill] sm:$0xff] %v5009_v22  ;;  %v1694_v46 = vrot.slane %v4896_v18, 1 }
 0x177   : > { %2001 = vrot.lane.b32.xlu1 %v1915_v49, %s3952_s22  ;;  %v1855_v2 = vor.u32 %v1854_v27, %v1853_v8 }
 0x178   : > { %1777 = vrot.lane.b32.xlu0 %v1691_v20, %s3954_s16 }
 0x179   : > { %v5015_v8 = vsel %vm1800_vm4, %v1851_v57, %v1855_v2 }
 0x17a   : > { %5732 = vst [vmem:[#allocation12_spill] sm:$0xff] %v5015_v8  ;;  %v1886_v8 = vshll.u32 %v5001_v19, 16 }
 0x17b   : > { %1950 = vrot.lane.b32.xlu1 %v1915_v49, %s3953_s8  ;;  %v4971_v49 = vshll.u32 %v4921_v4, 16 }
 0x17c   : > { %1726 = vrot.lane.b32.xlu0 %v1691_v20, %s3952_s22  ;;  %v4980_v20 = vshll.u32 %v4934_v29, 16 }
 0x17d   : > { %v1862_v58 = vrot.slane %v4971_v49, 2 }
 0x17f   : > { %2129 = vrot.lane.b32.xlu1 %v2064_v38, %s3954_s16  ;;  %v1858_v38 = vrot.slane %v4961_v37, 2 }
 0x180   : > { %1779 = vrot.lane.b32.xlu0 %v1693_v47, %s3954_s16  ;;  %v4958_v55 = vpop.permute.xlu0 %1708 }
 0x181   : > { %v1859_v61 = vor.u32 %v1858_v38, %v1857_v1  ;;  %v1870_v1 = vrot.slane %v4980_v20, 2  ;;  %v5734_v38 = vshrl.u32 %v4955_v51, 16 }
 0x183   : > { %2131 = vrot.lane.b32.xlu1 %v2068_v3, %s3954_s16  ;;  %v1861_v3 = vrot.slane %v4964_v5, 1  ;;  %v5021_v31 = vsel %vm1800_vm4, %v1855_v2, %v1859_v61  ;;  %v1876_v22 = vrot.slane %v5734_v38, 1  ;;  %v5737_v2 = vrot.slane %v4890_v33, 1 }
 0x184   : > { %1728 = vrot.lane.b32.xlu0 %v1693_v47, %s3952_s22  ;;  %5733 = vst [vmem:[#allocation13_spill] sm:$0xff] %v5021_v31  ;;  %v1871_v38 = vor.u32 %v1870_v1, %v1869_v10  ;;  %v1888_v31 = vrot.slane %v1886_v8, 2  ;;  %v2069_v10 = vrot.slane %v4941_v35, 2  ;;  %v5743_v1 = vrot.slane %v4874_v0, 1 }
 0x185   : > { %v4998_v25 = vpop.permute.xlu0 %1631  ;;  %v1863_v27 = vor.u32 %v1862_v58, %v1861_v3  ;;  %v5736_v58 = vshll.u32 %v4955_v51, 16  ;;  %v1883_v3 = vshrl.u32 %v5001_v19, 16  ;;  %v1574_v44 = vsel %vm1482_vm8, %v4930_v14, %v5737_v2 }
 0x186   : > { %v5054_v14 = vsel %vm1800_vm4, %v1867_v52, %v1871_v38 }
 0x187   : > { %2003 = vrot.lane.b32.xlu1 %v4927_v56, %s3952_s22  ;;  %v5029_v47 = vsel %vm1800_vm4, %v1859_v61, %v1863_v27  ;;  %v1879_v57 = vrot.slane %v5736_v58, 2  ;;  %v5043_v61 = vsel %vm1800_vm4, %v1863_v27, %v1867_v52  ;;  %5741 = vst [vmem:[#allocation16_spill] sm:$0xff] %v5054_v14  ;;  %v2070_v27 = vrot.slane %v4938_v39, 3 }
 0x188   : > { %1649 = vrot.lane.b32.xlu0 %v1566_v21, %s3953_s8  ;;  %v5018_v28 = vpop.permute.xlu1 %1710  ;;  %5735 = vst [vmem:[#allocation14_spill] sm:$0xff] %v5029_v47  ;;  %5738 = vst [vmem:[#allocation15_spill] sm:$0xff] %v5043_v61  ;;  %v1885_v47 = vrot.slane %v1883_v3, 1  ;;  %v5746_v61 = vrot.slane %v4908_v63, 2 }
 0x189   : > { %v5026_v21 = vpop.permute.xlu0 %1934  ;;  %v1880_v58 = vor.u32 %v1879_v57, %v1876_v22  ;;  %v1695_v57 = vsel %vm1670_vm5, %v5743_v1, %v1694_v46 }
 0x18a   : > { %v1889_v8 = vor.u32 %v1888_v31, %v1885_v47  ;;  %v5723_v47 = vrot.slane %v4908_v63, 1 }
 0x18b   : > { %1952 = vrot.lane.b32.xlu1 %v4927_v56, %s3953_s8  ;;  %v5739_v56 = vrot.slane %v4908_v63, 2  ;;  %v5061_v22 = vsel %vm1800_vm4, %v1871_v38, %v1880_v58  ;;  %v2074_v38 = vrot.slane %v4950_v59, 3 }
 0x18c   : > { %1651 = vrot.lane.b32.xlu0 %v1574_v44, %s3953_s8  ;;  %v5046_v13 = vpop.permute.xlu1 %1763  ;;  %5742 = vst [vmem:[#allocation17_spill] sm:$0xff] %v5061_v22  ;;  %v2071_v44 = vor.u32 %v2070_v27, %v2069_v10  ;;  %v1697_v10 = vsel %vm1670_vm5, %v1694_v46, %v5723_v47  ;;  %v1802_v27 = vshrl.u32 %v4452_v9, 16 }
 0x18d   : > { %v1919_v43 = vsel %vm1894_vm12, %v5740_v30, %v5739_v56  ;;  %v5056_v2 = vpop.permute.xlu0 %1761  ;;  %v5069_v30 = vsel %vm1800_vm4, %v1880_v58, %v1889_v8  ;;  %v2073_v56 = vrot.slane %v4944_v60, 2 }
 0x18e   : > { %5744 = vst [vmem:[#allocation18_spill] sm:$0xff] %v5069_v30  ;;  %v2072_v58 = vsel %vm2024_vm0, %v4911_v7, %v2071_v44  ;;  %v1920_v7 = vrot.slane %v4913_v54, 2 }
 0x18f   : > { %2005 = vrot.lane.b32.xlu1 %v1919_v43, %s3952_s22  ;;  %v5080_v8 = vor.u32 %v2074_v38, %v2073_v56  ;;  %v1581_v56 = vrot.slane %v4938_v39, 1  ;;  %v1804_v38 = vrot.slane %v1802_v27, 1  ;;  %v1922_v27 = vrot.slane %v4921_v4, 2 }
 0x190   : > { %1781 = vrot.lane.b32.xlu0 %v1695_v57, %s3954_s16  ;;  %v5071_v52 = vpop.permute.xlu1 %1712 }
 0x191   : > { %v1988_v3 = vpop.permute.xlu0 %1987  ;;  %v2076_v22 = vsel %vm2024_vm0, %v2071_v44, %v5080_v8 }
 0x193   : > { %1954 = vrot.lane.b32.xlu1 %v1919_v43, %s3953_s8  ;;  %v1805_v43 = vshll.u32 %v4452_v9, 16  ;;  %v5745_v9 = vrot.slane %v4890_v33, 1 }
 0x194   : > { %1730 = vrot.lane.b32.xlu0 %v1695_v57, %s3952_s22  ;;  %v1933_v31 = vpop.permute.xlu1 %1932 }
 0x195   : > { %v1937_v1 = vpop.permute.xlu0 %1936  ;;  %v1577_v47 = vor.u32 %v4893_v41, %v5745_v9  ;;  %v1388_v41 = vld [vmem:[#allocation2 + $0x10] sm:$0x8] }
 0x197   : > { %2133 = vrot.lane.b32.xlu1 %v2072_v58, %s3954_s16  ;;  %v1807_v58 = vrot.slane %v1805_v43, 2  ;;  %v1582_v39 = vsel %vm1482_vm8, %v1577_v47, %v1581_v56  ;;  %v3873_v47 = vld [vmem:[#allocation2 + $0x14] sm:$0xf] }
 0x198   : > { %1783 = vrot.lane.b32.xlu0 %v1697_v10, %s3954_s16  ;;  %v1986_v57 = vpop.permute.xlu1 %1985  ;;  %v3412_v9 = vcombine.low %v1388_v41, %v3873_v47 }
 0x199   : > { %v1990_v30 = vpop.permute.xlu0 %1989  ;;  %v1808_v33 = vor.u32 %v1807_v58, %v1804_v38 }
 0x19b   : > { %2135 = vrot.lane.b32.xlu1 %v2076_v22, %s3954_s16  ;;  %v1921_v22 = vsel %vm1894_vm12, %v5746_v61, %v1920_v7  ;;  %v1589_v61 = vrot.slane %v4950_v59, 1 }
 0x19c   : > { %1732 = vrot.lane.b32.xlu0 %v1697_v10, %s3952_s22  ;;  %v1634_v46 = vpop.permute.xlu1 %1633  ;;  %v1585_v10 = vor.u32 %v4941_v35, %v1581_v56  ;;  %v1812_v56 = vsel %vm1800_vm4, %v1808_v33, %v4800_v62  ;;  %v2078_v33 = vrot.slane %v4961_v37, 3 }
 0x19d   : > { %v2196_v14 = vsel %vm2192_vm14, %v4398_v17, %v1634_v46  ;;  %v5100_v44 = vpop.permute.xlu0 %1938  ;;  %v2326_v17 = vsel %vm2192_vm14, %v4811_v45, %v5026_v21  ;;  %v2323_v62 = vsel %vm2192_vm14, %v1812_v56, %v1933_v31 }
 0x19e   : > { %v2233_v46 = vsel %vm2229_vm6, %v2196_v14, %v5018_v28  ;;  %v2378_v35 = vsel %vm2229_vm6, %v2326_v17, %v1988_v3  ;;  %v1590_v45 = vsel %vm1482_vm8, %v1585_v10, %v1589_v61  ;;  %v1923_v28 = vsel %vm1894_vm12, %v1920_v7, %v1922_v27  ;;  %v5151_v17 = vld [vmem:[#allocation2 + $0x18] sm:$0xff]  }
 0x19f   : > { %2007 = vrot.lane.b32.xlu1 %v1921_v22, %s3952_s22  ;;  %v1698_v14 = vrot.slane %v4913_v54, 1  ;;  %v2194_v3 = vsel %vm2192_vm14, %v4402_v23, %v4998_v25  ;;  %v2271_v58 = vsel %vm2266_vm7, %v2233_v46, %v5046_v13  ;;  %v2376_v7 = vsel %vm2229_vm6, %v2323_v62, %v1986_v57  ;;  %v5174_v62 = vld [vmem:[#allocation2 + $0x28] sm:$0xff]  }
 0x1a0   : > { %1653 = vrot.lane.b32.xlu0 %v1582_v39, %s3953_s8  ;;  %v2155_v10 = vrot.slane %v3412_v9, 3  ;;  %v2077_v13 = vrot.slane %v4953_v42, 2 }
 0x1a1   : > { %v1636_v43 = vpop.permute.xlu1 %1635 }
 0x1a2   : > { %v2118_v38 = vpop.permute.xlu0 %2117  ;;  %v2198_v25 = vsel %vm2192_vm14, %v4449_v53, %v1636_v43  ;;  %v2156_v53 = vrot.slane %v5151_v17, 3  ;;  %v3862_v43 = vld [vmem:[%s5715_s4 + $0x88] sm:$0xff]  }
 0x1a3   : > { %1956 = vrot.lane.b32.xlu1 %v1921_v22, %s3953_s8  ;;  %v2415_v21 = vsel %vm2266_vm7, %v2378_v35, %v2118_v38  ;;  %v2329_v22 = vsel %vm2192_vm14, %v4825_v15, %v1937_v1  ;;  %v2231_v15 = vsel %vm2229_vm6, %v2194_v3, %v4958_v55  ;;  %v5747_v1 = vrot.slane %v4908_v63, 1 }
 0x1a4   : > { %1655 = vrot.lane.b32.xlu0 %v1590_v45, %s3953_s8  ;;  %2710 = vmatprep.mubr.bf16.mxu1 %v2415_v21  ;;  %v2380_v23 = vsel %vm2229_vm6, %v2329_v22, %v1990_v30  ;;  %v2268_v55 = vsel %vm2266_vm7, %v2231_v15, %v5056_v2  ;;  %v2157_v47 = vsel %vm2154_vm10, %v2155_v10, %v2156_v53  ;;  %v2081_v2 = vrot.slane %v4964_v5, 2 }
 0x1a5   : > { %2711 = vmatmul.mubr.bf16.vlgmr.msra.gmra.mrb[0].mxu1 %v2271_v58  ;;  %v2116_v39 = vpop.permute.xlu1 %2115  ;;  %v1699_v57 = vsel %vm1670_vm5, %v5747_v1, %v1698_v14  ;;  %v2235_v9 = vsel %vm2229_vm6, %v2198_v25, %v5071_v52  ;;  %v2079_v38 = vor.u32 %v2078_v33, %v2077_v13  ;;  %v2082_v45 = vrot.slane %v4971_v49, 3  ;;  %v5171_v52 = vld [vmem:[#allocation2 + $0x20] sm:$0xff]  }
 0x1a6   : > { %v2120_v31 = vpop.permute.xlu0 %2119  ;;  %v2412_v41 = vsel %vm2266_vm7, %v2376_v7, %v2116_v39  ;;  %v1700_v21 = vrot.slane %v4921_v4, 1  ;;  %v2160_v58 = vrot.slane %v5174_v62, 3  ;;  %v1593_v15 = vor.u32 %v4944_v60, %v1589_v61 }
 0x1a7   : > { %2009 = vrot.lane.b32.xlu1 %v1923_v28, %s3952_s22  ;;  %2702 = vmatprep.mubr.bf16.mxu0 %v2412_v41  ;;  %v2418_v30 = vsel %vm2266_vm7, %v2380_v23, %v2120_v31  ;;  %v5179_v7 = vor.u32 %v2082_v45, %v2081_v2  ;;  %v1924_v31 = vrot.slane %v4932_v40, 2  ;;  %v2162_v41 = vrot.slane %v4666_v6, 3 }
 0x1a8   : > { %1785 = vrot.lane.b32.xlu0 %v1699_v57, %s3954_s16  ;;  %2718 = vmatprep.mubr.bf16.mxu1 %v2418_v30  ;;  %v1701_v39 = vsel %vm1670_vm5, %v1698_v14, %v1700_v21  ;;  %v1597_v14 = vrot.slane %v4961_v37, 1  ;;  %v2164_v1 = vrot.slane %v4690_v11, 3  ;;  %v2332_v11 = vsel %vm2192_vm14, %v4833_v32, %v5100_v44 }
 0x1a9   : > { %2703 = vmatmul.mubr.bf16.vlgmr.msra.gmra.mrb[44].mxu0 %v2268_v55  ;;  %v1766_v46 = vpop.permute.xlu1 %1765  ;;  %v2084_v25 = vsel %vm2024_vm0, %v2079_v38, %v5179_v7  ;;  %v1925_v30 = vsel %vm1894_vm12, %v1922_v27, %v1924_v31  ;;  %v2163_v6 = vsel %vm2154_vm10, %v2160_v58, %v2162_v41  ;;  %v1605_v27 = vrot.slane %v4971_v49, 1  ;;  %v5312_v49 = vld [vmem:[#allocation2 + $0x90] ss:$0 sps:$4 sm:$0x11]  }
 0x1aa   : > { %3633 = vmatpush3.bf16.msra.mxu0 %v4640_v34  ;;  %3636 = vmatprep.mubr.msk.bf16.mxu0 %vm2192_vm14, %v2157_v47  ;;  %v1992_v35 = vpop.permute.xlu0 %1991  ;;  %v2274_v56 = vsel %vm2266_vm7, %v2235_v9, %v1766_v46  ;;  %v2158_v34 = vrot.slane %v5171_v52, 3  ;;  %v1598_v37 = vsel %vm1482_vm8, %v1593_v15, %v1597_v14  ;;  %v2165_v59 = vsel %vm2154_vm10, %v2162_v41, %v2164_v1 }
 0x1ab   : > { %1958 = vrot.lane.b32.xlu1 %v1923_v28, %s3953_s8  ;;  %3634 = vmatprep.subr.bf16.mxu0 %v3862_v43  ;;  %v2080_v28 = vsel %vm2024_vm0, %v5080_v8, %v2079_v38  ;;  %v2382_v61 = vsel %vm2229_vm6, %v2332_v11, %v1992_v35  ;;  %v1926_v55 = vrot.slane %v4934_v29, 2  ;;  %v1702_v47 = vrot.slane %v4932_v40, 1 }
 0x1ac   : > { %1734 = vrot.lane.b32.xlu0 %v1699_v57, %s3952_s22  ;;  %v2159_v10 = vsel %vm2154_vm10, %v2156_v53, %v2158_v34  ;;  %v2161_v23 = vsel %vm2154_vm10, %v2158_v34, %v2160_v58  ;;  %v1601_v53 = vor.u32 %v4953_v42, %v1597_v14  ;;  %v2166_v9 = vrot.slane %v4768_v50, 3 }
 0x1ad   : > { %2719 = vmatmul.mubr.bf16.gmra.mrb[4].mxu1 %v2274_v56  ;;  %v1715_v3 = vpop.permute.xlu1 %1714  ;;  %v2168_v38 = vrot.slane %v4796_v48, 3  ;;  %v1927_v34 = vsel %vm1894_vm12, %v1924_v31, %v1926_v55  ;;  %v2086_v58 = vrot.slane %v4974_v26, 3  ;;  %v1703_v50 = vsel %vm1670_vm5, %v1700_v21, %v1702_v47 }
 0x1ae   : > { %3635 = vmatpush3.bf16.msra.mxu0 %v3862_v43  ;;  %v1941_v22 = vpop.permute.xlu0 %1940  ;;  %v1606_v32 = vsel %vm1482_vm8, %v1601_v53, %v1605_v27  ;;  %v2170_v31 = vrot.slane %v4858_v36, 3  ;;  %v2172_v41 = vrot.slane %v4874_v0, 3  ;;  %v5289_v11 = vrot.slane %v4955_v51, 2 }
 0x1af   : > { %2137 = vrot.lane.b32.xlu1 %v2080_v28, %s3954_s16  ;;  %v2335_v35 = vsel %vm2192_vm14, %v4852_v12, %v1941_v22  ;;  %v2167_v22 = vsel %vm2154_vm10, %v2164_v1, %v2166_v9 }
 0x1b0   : > { %1787 = vrot.lane.b32.xlu0 %v1701_v39, %s3954_s16  ;;  %v2171_v36 = vsel %vm2154_vm10, %v2168_v38, %v2170_v31  ;;  %v2173_v53 = vsel %vm2154_vm10, %v2170_v31, %v2172_v41 }
 0x1b1   : > { %3637 = vmatmul.mubr.msk.bf16.vlgmr.msra.gmra.mrb[48].mxu0 %vm2192_vm14, %v2159_v10  ;;  %v1768_v33 = vpop.permute.xlu1 %1767 }
 0x1b2   : > { %3640 = vmatprep.mubr.msk.bf16.mxu0 %vm2192_vm14, %v2161_v23  ;;  %v1994_v8 = vpop.permute.xlu0 %1993  ;;  %v2090_v23 = vrot.slane %v4980_v20, 3 }
 0x1b3   : > { %2139 = vrot.lane.b32.xlu1 %v2084_v25, %s3954_s16  ;;  %v2384_v2 = vsel %vm2229_vm6, %v2335_v35, %v1994_v8  ;;  %v5260_v8 = vrot.slane %v4934_v29, 1 }
 0x1b4   : > { %1736 = vrot.lane.b32.xlu0 %v1701_v39, %s3952_s22  ;;  %v2169_v39 = vsel %vm2154_vm10, %v2166_v9, %v2168_v38  ;;  %v5749_v38 = vshll.u32 %v4955_v51, 16 }
 0x1b5   : > { %v1717_v13 = vpop.permute.xlu1 %1716 }
 0x1b6   : > { %v5201_v57 = vpop.permute.xlu0 %1942 }
 0x1b7   : > { %2011 = vrot.lane.b32.xlu1 %v1925_v30, %s3952_s22 }
 0x1b8   : > { %1657 = vrot.lane.b32.xlu0 %v1598_v37, %s3953_s8 }
 0x1b9   : > { %3641 = vmatmul.mubr.msk.bf16.gmra.mrb[52].mxu0 %vm2192_vm14, %v2163_v6  ;;  %v1638_v60 = vpop.permute.xlu1 %1637 }
 0x1ba   : > { %v2200_v42 = vsel %vm2192_vm14, %v5151_v17, %v1638_v60  ;;  %3644 = vmatprep.mubr.msk.bf16.mxu0 %vm2192_vm14, %v2165_v59  ;;  %v2122_v43 = vpop.permute.xlu0 %2121  ;;  %v1613_v60 = vrot.slane %v4974_v26, 1  ;;  %v2174_v59 = vrot.slane %v4896_v18, 3  ;;  %v5307_v26 = vld [vmem:[#allocation2 + $0x98] sm:$0xff]  }
 0x1bb   : > { %1960 = vrot.lane.b32.xlu1 %v1925_v30, %s3953_s8  ;;  %v2421_v44 = vsel %vm2266_vm7, %v2382_v61, %v2122_v43  ;;  %v2237_v46 = vsel %vm2229_vm6, %v2200_v42, %v1715_v3  ;;  %v2085_v3 = vrot.slane %v4977_v16, 2  ;;  %v1705_v30 = vsel %vm1670_vm5, %v1702_v47, %v5260_v8 }
 0x1bc   : > { %1659 = vrot.lane.b32.xlu0 %v1606_v32, %s3953_s8  ;;  %2726 = vmatprep.mubr.bf16.mxu1 %v2421_v44  ;;  %v2277_v17 = vsel %vm2266_vm7, %v2237_v46, %v1768_v33  ;;  %v2089_v33 = vrot.slane %v4988_v24, 2  ;;  %v1609_v42 = vor.u32 %v4964_v5, %v1605_v27  ;;  %v2176_v43 = vrot.slane %v4908_v63, 3 }
 0x1bd   : > { %v1640_v56 = vpop.permute.xlu1 %1639  ;;  %2727 = vmatmul.mubr.bf16.gmra.mrb[8].mxu1 %v2277_v17  ;;  %v2087_v21 = vor.u32 %v2086_v58, %v2085_v3  ;;  %v1929_v44 = vsel %vm1894_vm12, %v1926_v55, %v5289_v11  ;;  %v1617_v47 = vor.u32 %v4977_v16, %v1613_v60  ;;  %v2175_v5 = vsel %vm2154_vm10, %v2172_v41, %v2174_v59 }
 0x1be   : > { %v2124_v45 = vpop.permute.xlu0 %2123  ;;  %v2202_v48 = vsel %vm2192_vm14, %v5171_v52, %v1640_v56  ;;  %v1614_v46 = vsel %vm1482_vm8, %v1609_v42, %v1613_v60  ;;  %v2177_v17 = vsel %vm2154_vm10, %v2174_v59, %v2176_v43  ;;  %v1621_v55 = vrot.slane %v4980_v20, 1 }
 0x1bf   : > { %2013 = vrot.lane.b32.xlu1 %v1927_v34, %s3952_s22  ;;  %v2424_v12 = vsel %vm2266_vm7, %v2384_v2, %v2124_v45  ;;  %v2239_v52 = vsel %vm2229_vm6, %v2202_v48, %v1717_v13  ;;  %v2088_v1 = vsel %vm2024_vm0, %v5179_v7, %v2087_v21  ;;  %v5272_v13 = vor.u32 %v2090_v23, %v2089_v33 }
 0x1c0   : > { %1789 = vrot.lane.b32.xlu0 %v1703_v50, %s3954_s16  ;;  %2734 = vmatprep.mubr.bf16.mxu1 %v2424_v12  ;;  %v1981_v35 = vrot.slane %v5307_v26, 2  ;;  %v5748_v16 = vshrl.u32 %v4955_v51, 16  ;;  %v2094_v2 = vrot.slane %v5749_v38, 3  ;;  %v1622_v45 = vsel %vm1482_vm8, %v1617_v47, %v1621_v55 }
 0x1c1   : > { %3645 = vmatmul.mubr.msk.bf16.gmra.mrb[56].mxu0 %vm2192_vm14, %v2167_v22  ;;  %v1770_v28 = vpop.permute.xlu1 %1769  ;;  %v2092_v6 = vsel %vm2024_vm0, %v2087_v21, %v5272_v13  ;;  %v1627_v20 = vshll.u32 %v5312_v49, 16  ;;  %v2178_v3 = vrot.slane %v4913_v54, 3  ;;  %v2184_v60 = vrot.slane %v4934_v29, 3  ;;  %v819_v29 = vld [vmem:[%s5714_s3 + $0x150] sm:$0x3f] }
 0x1c2   : > { %3648 = vmatprep.mubr.msk.bf16.mxu0 %vm2192_vm14, %v2169_v39  ;;  %v5253_v10 = vpop.permute.xlu0 %1995  ;;  %v2280_v25 = vsel %vm2266_vm7, %v2239_v52, %v1770_v28  ;;  %v2093_v56 = vrot.slane %v5748_v16, 2  ;;  %v1982_v48 = vsel %vm1894_vm12, %v5289_v11, %v1981_v35  ;;  %v2098_v28 = vshrl.u32 %v5307_v26, 16 }
 0x1c3   : > { %1962 = vrot.lane.b32.xlu1 %v1927_v34, %s3953_s8  ;;  %v1757_v34 = vrot.slane %v4955_v51, 1  ;;  %v2101_v39 = vshll.u32 %v5307_v26, 16  ;;  %v2179_v21 = vsel %vm2154_vm10, %v2176_v43, %v2178_v3  ;;  %v1625_v52 = vor.u32 %v4988_v24, %v1621_v55  ;;  %v5751_v55 = vld [vmem:[#allocation7_spill] sm:$0xff] }
 0x1c4   : > { %1738 = vrot.lane.b32.xlu0 %v1703_v50, %s3952_s22  ;;  %v2180_v50 = vrot.slane %v4921_v4, 3  ;;  %v2095_v22 = vor.u32 %v2094_v2, %v2093_v56  ;;  %v1629_v4 = vrot.slane %v1627_v20, 1  ;;  %v1930_v24 = vrot.slane %v5001_v19, 2 }
 0x1c5   : > { %v5265_v14 = vpop.permute.xlu1 %1718  ;;  %2735 = vmatmul.mubr.bf16.gmra.mrb[12].mxu1 %v2280_v25  ;;  %v1758_v54 = vsel %vm1670_vm5, %v5260_v8, %v1757_v34 }
 0x1c6   : > { %v5268_v15 = vpop.permute.xlu0 %1944  ;;  %v2181_v23 = vsel %vm2154_vm10, %v2178_v3, %v2180_v50  ;;  %v2096_v41 = vsel %vm2024_vm0, %v5272_v13, %v2095_v22  ;;  %v5750_v13 = vld [vmem:[#allocation6_spill] sm:$0xff]  ;;  %v1931_v43 = vsel %vm1894_vm12, %v5289_v11, %v1930_v24 }
 0x1c7   : > { %2141 = vrot.lane.b32.xlu1 %v2088_v1, %s3954_s16  ;;  %v2100_v1 = vrot.slane %v2098_v28, 2  ;;  %v2338_v59 = vsel %vm2192_vm14, %v5750_v13, %v5201_v57  ;;  %v2341_v16 = vsel %vm2192_vm14, %v5751_v55, %v5268_v15 }
 0x1c8   : > { %1791 = vrot.lane.b32.xlu0 %v1705_v30, %s3954_s16  ;;  %v2386_v47 = vsel %vm2229_vm6, %v2338_v59, %v5253_v10 }
 0x1c9   : > { %3649 = vmatmul.mubr.msk.bf16.gmra.mrb[60].mxu0 %vm2192_vm14, %v2171_v36  ;;  %v5280_v37 = vpop.permute.xlu1 %1771  ;;  %v5363_v36 = vld [vmem:[#allocation2 + $0xa0] ss:$0 sps:$4 sm:$0x77]  }
 0x1ca   : > { %3652 = vmatprep.mubr.msk.bf16.mxu0 %vm2192_vm14, %v2173_v53  ;;  %v5284_v7 = vpop.permute.xlu0 %1997  ;;  %v1630_v53 = vsel %vm1482_vm8, %v1625_v52, %v1629_v4  ;;  %v2107_v57 = vshrl.u32 %v5363_v36, 16  ;;  %vm862_vm8 = vcmp.gt.f32.partialorder %v819_v29, 0.5  ;;  %v2188_v4 = vrot.slane %v5307_v26, 3  ;;  %v3879_v29 = vld [vmem:[#allocation2 + $0x40] sm:$0xff]  }
 0x1cb   : > { %2143 = vrot.lane.b32.xlu1 %v2092_v6, %s3954_s16  ;;  %v1706_v6 = vrot.slane %v5312_v49, 1  ;;  %v2388_v2 = vsel %vm2229_vm6, %v2341_v16, %v5284_v7  ;;  %v2186_v7 = vrot.slane %v4955_v51, 3  ;;  %v3880_v16 = vld [vmem:[#allocation2 + $0x48] sm:$0xff]  }
 0x1cc   : > { %1740 = vrot.lane.b32.xlu0 %v1705_v30, %s3952_s22  ;;  %v2103_v30 = vrot.slane %v2101_v39, 3  ;;  %v2109_v20 = vrot.slane %v2107_v57, 2  ;;  %v5752_v39 = vmov 0  }
 0x1cd   : > { %v5295_v61 = vpop.permute.xlu1 %1720 }
 0x1ce   : > { %v5301_v32 = vpop.permute.xlu0 %1722  ;;  %v2104_v49 = vor.u32 %v2103_v30, %v2100_v1  ;;  %v3878_v30 = vld [vmem:[#allocation2 + $0x38] sm:$0xff]  }
 0x1cf   : > { %2015 = vrot.lane.b32.xlu1 %v1929_v44, %s3952_s22 }
 0x1d0   : > { %1661 = vrot.lane.b32.xlu0 %v1614_v46, %s3953_s8  ;;  %v3870_v46 = vld [vmem:[#allocation2 + $0xa0] ss:$0 sps:$4 sm:$0x33]  }
 0x1d1   : > { %3653 = vmatmul.mubr.msk.bf16.gmra.mrb[64].mxu0 %vm2192_vm14, %v2175_v5  ;;  %v1642_v27 = vpop.permute.xlu1 %1641  ;;  %v2110_v5 = vshll.u32 %v5363_v36, 16  ;;  %v1983_v38 = vrot.slane %v3870_v46, 2  ;;  %v5754_v46 = vld [vmem:[#allocation9_spill] sm:$0xff] }
 0x1d2   : > { %3656 = vmatprep.mubr.msk.bf16.mxu0 %vm2192_vm14, %v2177_v17  ;;  %v5320_v9 = vpop.permute.xlu0 %1775  ;;  %v2204_v25 = vsel %vm2192_vm14, %v5174_v62, %v1642_v27  ;;  %v2182_v62 = vrot.slane %v4932_v40, 3 }
 0x1d3   : > { %1964 = vrot.lane.b32.xlu1 %v1929_v44, %s3953_s8  ;;  %v2241_v19 = vsel %vm2229_vm6, %v2204_v25, %v5265_v14  ;;  %v3869_v44 = vld [vmem:[#allocation2 + $0x98] ss:$0 sps:$4 sm:$0x11]   ;;  %v1707_v14 = vsel %vm1670_vm5, %v5260_v8, %v1706_v6  ;;  %v2112_v3 = vrot.slane %v2110_v5, 3  ;;  %v2187_v25 = vsel %vm2154_vm10, %v2184_v60, %v2186_v7 }
 0x1d4   : > { %1663 = vrot.lane.b32.xlu0 %v1622_v45, %s3953_s8  ;;  %v2283_v10 = vsel %vm2266_vm7, %v2241_v19, %v5280_v37  ;;  %v2183_v27 = vsel %vm2154_vm10, %v2180_v50, %v2182_v62  ;;  %v2185_v17 = vsel %vm2154_vm10, %v2182_v62, %v2184_v60  ;;  %v1759_v56 = vrot.slane %v3869_v44, 1  ;;  %v5753_v62 = vld [vmem:[#allocation8_spill] sm:$0xff] }
 0x1d5   : > { %v5333_v58 = vpop.permute.xlu1 %1643  ;;  %v2105_v45 = vsel %vm2024_vm0, %v2095_v22, %v2104_v49 }
 0x1d6   : > { %v5336_v12 = vpop.permute.xlu0 %1724  ;;  %v1760_v15 = vsel %vm1670_vm5, %v1757_v34, %v1759_v56  ;;  %v1984_v34 = vsel %vm1894_vm12, %v1981_v35, %v1983_v38  ;;  %v2189_v35 = vsel %vm2154_vm10, %v2186_v7, %v2188_v4  ;;  %vm3956_vm12 = vmmov 0  }
 0x1d7   : > { %2017 = vrot.lane.b32.xlu1 %v1982_v48, %s3952_s22  ;;  %v3877_v48 = vld [vmem:[#allocation2 + $0x30] sm:$0xff]  }
 0x1d8   : > { %1793 = vrot.lane.b32.xlu0 %v1758_v54, %s3954_s16  ;;  %v2206_v28 = vsel %vm2192_vm14, %v3877_v48, %v5333_v58  ;;  %v905_v54 = vsel %vm862_vm8, 1, %v5752_v39  ;;  %v818_v58 = vld [vmem:[%s5714_s3 + $0x148] sm:$0xff]  ;;  %v5756_v48 = vld [vmem:[#allocation11_spill] sm:$0xff] }
 0x1d9   : > { %3657 = vmatmul.mubr.msk.bf16.gmra.mrb[68].mxu0 %vm2192_vm14, %v2179_v21  ;;  %v5352_v33 = vpop.permute.xlu1 %1773  ;;  %v2243_v51 = vsel %vm2229_vm6, %v2206_v28, %v5295_v61  ;;  %vm861_vm5 = vcmp.gt.f32.partialorder %v818_v58, 0.5 }
 0x1da   : > { %3660 = vmatprep.mubr.msk.bf16.mxu0 %vm2192_vm14, %v2181_v23  ;;  %v5359_v31 = vpop.permute.xlu0 %1645  ;;  %v2113_v23 = vor.u32 %v2112_v3, %v2109_v20  ;;  %v2286_v52 = vsel %vm2266_vm7, %v2243_v51, %v5352_v33  ;;  %v904_v61 = vsel %vm861_vm5, 1, %v5752_v39  ;;  %v2190_v33 = vrot.slane %v5363_v36, 3 }
 0x1db   : > { %2145 = vrot.lane.b32.xlu1 %v2096_v41, %s3954_s16 }
 0x1dc   : > { %1665 = vrot.lane.b32.xlu0 %v1630_v53, %s3953_s8  ;;  %v2114_v1 = vsel %vm2024_vm0, %v2104_v49, %v2113_v23  ;;  %v2208_v53 = vsel %vm2192_vm14, %v3878_v30, %v5359_v31  ;;  %v2191_v13 = vsel %vm2154_vm10, %v2188_v4, %v2190_v33  ;;  %v3881_v4 = vld [vmem:[#allocation2 + $0x50] sm:$0xff]   ;;  %v5757_v33 = vld [vmem:[#allocation12_spill] sm:$0xff] }
 0x1dd   : > { %v5375_v42 = vpop.permute.xlu1 %1946  ;;  %v2245_v59 = vsel %vm2229_vm6, %v2208_v53, %v5301_v32 }
 0x1de   : > { %v2126_v40 = vpop.permute.xlu0 %2125  ;;  %v2344_v60 = vsel %vm2192_vm14, %v5753_v62, %v5375_v42  ;;  %v2289_v44 = vsel %vm2266_vm7, %v2245_v59, %v5320_v9  ;;  %v5758_v59 = vld [vmem:[#allocation13_spill] sm:$0xff] }
 0x1df   : > { %1966 = vrot.lane.b32.xlu1 %v1931_v43, %s3953_s8  ;;  %v2427_v11 = vsel %vm2266_vm7, %v2386_v47, %v2126_v40  ;;  %s3887_s8 = scalar_lea.vmem %s5671_s13, 16 }
 0x1e0   : > { %1742 = vrot.lane.b32.xlu0 %v1707_v14, %s3952_s22  ;;  %2742 = vmatprep.mubr.bf16.mxu1 %v2427_v11  ;;  %p3888_p11 = scmp.ne.s32.totalorder %s5671_s13, %s3887_s8 }
 0x1e1   : > { %2743 = vmatmul.mubr.bf16.gmra.mrb[16].mxu1 %v2283_v10  ;;  %3661 = vmatmul.mubr.msk.bf16.gmra.mrb[72].mxu0 %vm2192_vm14, %v2183_v27  ;;  %v2000_v8 = vpop.permute.xlu1 %1999 }
 0x1e2   : > { %3664 = vmatprep.mubr.msk.bf16.mxu0 %vm2192_vm14, %v2185_v17  ;;  %v2128_v37 = vpop.permute.xlu0 %2127  ;;  %v2390_v43 = vsel %vm2229_vm6, %v2344_v60, %v2000_v8  ;;  %p3889_p12 = pnand %p3888_p11, %p4037_p5 }
 0x1e3   : > { %2147 = vrot.lane.b32.xlu1 %v2105_v45, %s3954_s16  ;;  %v2430_v50 = vsel %vm2266_vm7, %v2388_v2, %v2128_v37  ;;  %v5755_v2 = vld [vmem:[#allocation10_spill] sm:$0xff] }
 0x1e4   : > { %1795 = vrot.lane.b32.xlu0 %v1760_v15, %s3954_s16  ;;  %2750 = vmatprep.mubr.bf16.mxu1 %v2430_v50  ;;  %p3890_p13 = pneg %p3889_p12 }
 0x1e5   : > { %v1949_v22 = vpop.permute.xlu1 %1948 }
 0x1e6   : > { %v1648_v21 = vpop.permute.xlu0 %1647  ;;  %v2347_v42 = vsel %vm2192_vm14, %v5754_v46, %v1949_v22 }
 0x1e7   : > { %2019 = vrot.lane.b32.xlu1 %v1984_v34, %s3952_s22  ;;  %v2210_v57 = vsel %vm2192_vm14, %v3879_v29, %v1648_v21  ;;  %s3893_s22 = scalar_lea.vmem %s3892_s18, 32 }
 0x1e8   : > { %1033 = vperm.xlu0 %3801, %v905_v54   ;;  %v2247_v11 = vsel %vm2229_vm6, %v2210_v57, %v5336_v12  ;;  %p3895_p1 = scmp.lt.s32.totalorder %s3893_s22, %s3887_s8 }
 0x1e9   : > { %2751 = vmatmul.mubr.bf16.gmra.mrb[20].mxu1 %v2286_v52  ;;  %3665 = vmatmul.mubr.msk.bf16.gmra.mrb[76].mxu0 %vm2192_vm14, %v2187_v25  ;;  %v2002_v26 = vpop.permute.xlu1 %2001 }
 0x1ea   : > { %3668 = vmatprep.mubr.msk.bf16.mxu0 %vm2192_vm14, %v2189_v35  ;;  %v1778_v41 = vpop.permute.xlu0 %1777  ;;  %v2392_v47 = vsel %vm2229_vm6, %v2347_v42, %v2002_v26  ;;  %p3896_p2 = por %p3895_p1, %p3894_p0 }
 0x1eb   : > { %2149 = vrot.lane.b32.xlu1 %v2114_v1, %s3954_s16  ;;  %v2292_v9 = vsel %vm2266_vm7, %v2247_v11, %v1778_v41 }
 0x1ec   : > { %p3897_p3 = pnand %p3896_p2, %p3890_p13 }
 0x1ed   : > { %v1951_v24 = vpop.permute.xlu1 %1950 }
 0x1ee   : > { %v1727_v6 = vpop.permute.xlu0 %1726  ;;  %v2350_v37 = vsel %vm2192_vm14, %v5755_v2, %v1951_v24 }
 0x1ef   : > { %1030 = vperm.xlu1 %3802, %v904_v61  }
 0x1f1   : > { %3669 = vmatmul.mubr.msk.bf16.gmra.mrb[80].mxu0 %vm2192_vm14, %v2191_v13  ;;  %v2130_v36 = vpop.permute.xlu1 %2129 }
 0x1f2   : > { %v1780_v19 = vpop.permute.xlu0 %1779  ;;  %v2433_v31 = vsel %vm2266_vm7, %v2390_v43, %v2130_v36 }
 0x1f3   : > { %2758 = vmatprep.mubr.bf16.mxu1 %v2433_v31 }
 0x1f4   : > { %2759 = vmatmul.mubr.bf16.gmra.mrb[24].mxu1 %v2289_v44 }
 0x1f5   : > { %v2132_v40 = vpop.permute.xlu1 %2131 }
 0x1f6   : > { %v1729_v32 = vpop.permute.xlu0 %1728  ;;  %v2436_v49 = vsel %vm2266_vm7, %v2392_v47, %v2132_v40 }
 0x1f7   : > { %2766 = vmatprep.mubr.bf16.mxu1 %v2436_v49 }
 0x1f9   : > { %v2004_v5 = vpop.permute.xlu1 %2003 }
 0x1fa   : > { %v1650_v14 = vpop.permute.xlu0 %1649  ;;  %v2394_v20 = vsel %vm2229_vm6, %v2350_v37, %v2004_v5 }
 0x1fb   : > { %v2212_v8 = vsel %vm2192_vm14, %v3880_v16, %v1650_v14 }
 0x1fc   : > { %2767 = vmatmul.mubr.bf16.gmra.mrb[28].mxu1 %v2292_v9  ;;  %v2249_v45 = vsel %vm2229_vm6, %v2212_v8, %v1727_v6  ;;  %v5759_v9 = vld [vmem:[#allocation14_spill] sm:$0xff] }
 0x1fd   : > { %v1953_v10 = vpop.permute.xlu1 %1952  ;;  %v2295_v50 = vsel %vm2266_vm7, %v2249_v45, %v1780_v19 }
 0x1fe   : > { %v1652_v27 = vpop.permute.xlu0 %1651  ;;  %v2353_v28 = vsel %vm2192_vm14, %v5756_v48, %v1953_v10 }
 0x1ff   : > { %v2214_v21 = vsel %vm2192_vm14, %v3881_v4, %v1652_v27 }
 0x200   : > { %v2251_v58 = vsel %vm2229_vm6, %v2214_v21, %v1729_v32  ;;  %v5761_v21 = vld [vmem:[#allocation16_spill] sm:$0xff] }
 0x201   : > { %v2006_v17 = vpop.permute.xlu1 %2005 }
 0x202   : > { %v1782_v55 = vpop.permute.xlu0 %1781  ;;  %v2396_v7 = vsel %vm2229_vm6, %v2353_v28, %v2006_v17 }
 0x203   : > { %v2298_v51 = vsel %vm2266_vm7, %v2251_v58, %v1782_v55 }
 0x205   : > { %v1955_v56 = vpop.permute.xlu1 %1954 }
 0x206   : > { %v1731_v38 = vpop.permute.xlu0 %1730  ;;  %v2356_v30 = vsel %vm2192_vm14, %v5757_v33, %v1955_v56  ;;  %v5760_v56 = vld [vmem:[#allocation15_spill] sm:$0xff] }
 0x209   : > { %v2134_v12 = vpop.permute.xlu1 %2133 }
 0x20a   : > { %v1784_v3 = vpop.permute.xlu0 %1783  ;;  %v2439_v15 = vsel %vm2266_vm7, %v2394_v20, %v2134_v12  ;;  %v3882_v20 = vld [vmem:[#allocation2 + $0x70] sm:$0xff]  }
 0x20b   : > { %2774 = vmatprep.mubr.bf16.mxu1 %v2439_v15 }
 0x20c   : > { %2775 = vmatmul.mubr.bf16.gmra.mrb[32].mxu1 %v2295_v50 }
 0x20d   : > { %v2136_v22 = vpop.permute.xlu1 %2135 }
 0x20e   : > { %v1733_v39 = vpop.permute.xlu0 %1732  ;;  %v2442_v54 = vsel %vm2266_vm7, %v2396_v7, %v2136_v22  ;;  %v3883_v22 = vld [vmem:[#allocation2 + $0x78] sm:$0xff]  }
 0x20f   : > { %2782 = vmatprep.mubr.bf16.mxu1 %v2442_v54 }
 0x211   : > { %v2008_v34 = vpop.permute.xlu1 %2007 }
 0x212   : > { %v1654_v23 = vpop.permute.xlu0 %1653  ;;  %v2398_v24 = vsel %vm2229_vm6, %v2356_v30, %v2008_v34 }
 0x213   : > { %v2216_v41 = vsel %vm2192_vm14, %v4874_v0, %v1654_v23 }
 0x214   : > { %2783 = vmatmul.mubr.bf16.gmra.mrb[36].mxu1 %v2298_v51  ;;  %v2253_v53 = vsel %vm2229_vm6, %v2216_v41, %v1731_v38  ;;  %v3884_v41 = vld [vmem:[#allocation2 + $0x80] sm:$0xff]  }
 0x215   : > { %v1957_v52 = vpop.permute.xlu1 %1956  ;;  %v2301_v13 = vsel %vm2266_vm7, %v2253_v53, %v1784_v3 }
 0x216   : > { %v1656_v25 = vpop.permute.xlu0 %1655  ;;  %v2359_v43 = vsel %vm2192_vm14, %v5758_v59, %v1957_v52  ;;  %v5763_v59 = vld [vmem:[#allocation18_spill] sm:$0xff] }
 0x217   : > { %v2218_v44 = vsel %vm2192_vm14, %v4896_v18, %v1656_v25 }
 0x218   : > { %v2255_v47 = vsel %vm2229_vm6, %v2218_v44, %v1733_v39 }
 0x219   : > { %v2010_v26 = vpop.permute.xlu1 %2009 }
 0x21a   : > { %v1786_v35 = vpop.permute.xlu0 %1785  ;;  %v2400_v0 = vsel %vm2229_vm6, %v2359_v43, %v2010_v26 }
 0x21b   : > { %v2304_v40 = vsel %vm2266_vm7, %v2255_v47, %v1786_v35 }
 0x21d   : > { %v1959_v1 = vpop.permute.xlu1 %1958 }
 0x21e   : > { %v1735_v61 = vpop.permute.xlu0 %1734  ;;  %v2362_v18 = vsel %vm2192_vm14, %v5759_v9, %v1959_v1 }
 0x221   : > { %v2138_v6 = vpop.permute.xlu1 %2137 }
 0x222   : > { %v1788_v62 = vpop.permute.xlu0 %1787  ;;  %v2445_v60 = vsel %vm2266_vm7, %v2398_v24, %v2138_v6 }
 0x223   : > { %2790 = vmatprep.mubr.bf16.mxu1 %v2445_v60 }
 0x224   : > { %2791 = vmatmul.mubr.bf16.gmra.mrb[40].mxu1 %v2301_v13 }
 0x225   : > { %v2140_v36 = vpop.permute.xlu1 %2139 }
 0x226   : > { %v1737_v19 = vpop.permute.xlu0 %1736  ;;  %v2448_v31 = vsel %vm2266_vm7, %v2400_v0, %v2140_v36  ;;  %v3885_v36 = vld [vmem:[#allocation2 + $0x88] sm:$0xff]  }
 0x227   : > { %2798 = vmatprep.mubr.bf16.mxu1 %v2448_v31 }
 0x229   : > { %v2012_v46 = vpop.permute.xlu1 %2011 }
 0x22a   : > { %v1658_v42 = vpop.permute.xlu0 %1657  ;;  %v2402_v27 = vsel %vm2229_vm6, %v2362_v18, %v2012_v46 }
 0x22b   : > { %v2220_v5 = vsel %vm2192_vm14, %v4908_v63, %v1658_v42 }
 0x22c   : > { %2799 = vmatmul.mubr.bf16.gmra.mrb[44].mxu1 %v2304_v40  ;;  %v2257_v10 = vsel %vm2229_vm6, %v2220_v5, %v1735_v61  ;;  %v5762_v61 = vld [vmem:[#allocation17_spill] sm:$0xff] }
 0x22d   : > { %v1961_v32 = vpop.permute.xlu1 %1960  ;;  %v2307_v8 = vsel %vm2266_vm7, %v2257_v10, %v1788_v62  ;;  %v5526_v10 = vld [vmem:[%s5716_s5] ss:$0 sm:$0xff] }
 0x22e   : > { %v1660_v49 = vpop.permute.xlu0 %1659  ;;  %v2365_v38 = vsel %vm2192_vm14, %v5760_v56, %v1961_v32 }
 0x22f   : > { %v2222_v12 = vsel %vm2192_vm14, %v3882_v20, %v1660_v49 }
 0x230   : > { %v2259_v50 = vsel %vm2229_vm6, %v2222_v12, %v1737_v19 }
 0x231   : > { %v2014_v29 = vpop.permute.xlu1 %2013 }
 0x232   : > { %v1790_v57 = vpop.permute.xlu0 %1789  ;;  %v2404_v63 = vsel %vm2229_vm6, %v2365_v38, %v2014_v29 }
 0x233   : > { %v2310_v48 = vsel %vm2266_vm7, %v2259_v50, %v1790_v57 }
 0x235   : > { %v1963_v14 = vpop.permute.xlu1 %1962 }
 0x236   : > { %v1739_v11 = vpop.permute.xlu0 %1738  ;;  %v2368_v34 = vsel %vm2192_vm14, %v5761_v21, %v1963_v14 }
 0x239   : > { %v2142_v17 = vpop.permute.xlu1 %2141 }
 0x23a   : > { %v1792_v55 = vpop.permute.xlu0 %1791  ;;  %v2451_v16 = vsel %vm2266_vm7, %v2402_v27, %v2142_v17 }
 0x23b   : > { %2806 = vmatprep.mubr.bf16.mxu1 %v2451_v16 }
 0x23c   : > { %2807 = vmatmul.mubr.bf16.gmra.mrb[48].mxu1 %v2307_v8 }
 0x23d   : > { %v2144_v2 = vpop.permute.xlu1 %2143 }
 0x23e   : > { %v1741_v37 = vpop.permute.xlu0 %1740  ;;  %v2454_v45 = vsel %vm2266_vm7, %v2404_v63, %v2144_v2 }
 0x23f   : > { %2814 = vmatprep.mubr.bf16.mxu1 %v2454_v45 }
 0x241   : > { %v2016_v3 = vpop.permute.xlu1 %2015 }
 0x242   : > { %v1662_v15 = vpop.permute.xlu0 %1661  ;;  %v2406_v58 = vsel %vm2229_vm6, %v2368_v34, %v2016_v3 }
 0x243   : > { %v2224_v39 = vsel %vm2192_vm14, %v3883_v22, %v1662_v15 }
 0x244   : > { %2815 = vmatmul.mubr.bf16.gmra.mrb[52].mxu1 %v2310_v48  ;;  %v2261_v23 = vsel %vm2229_vm6, %v2224_v39, %v1739_v11 }
 0x245   : > { %v1965_v28 = vpop.permute.xlu1 %1964  ;;  %v2313_v25 = vsel %vm2266_vm7, %v2261_v23, %v1792_v55 }
 0x246   : > { %v1664_v7 = vpop.permute.xlu0 %1663  ;;  %v2371_v33 = vsel %vm2192_vm14, %v5762_v61, %v1965_v28 }
 0x247   : > { %v2226_v1 = vsel %vm2192_vm14, %v3884_v41, %v1664_v7 }
 0x248   : > { %v2263_v62 = vsel %vm2229_vm6, %v2226_v1, %v1741_v37 }
 0x249   : > { %v2018_v54 = vpop.permute.xlu1 %2017 }
 0x24a   : > { %v1794_v4 = vpop.permute.xlu0 %1793  ;;  %v2408_v30 = vsel %vm2229_vm6, %v2371_v33, %v2018_v54 }
 0x24b   : > { %v2316_v60 = vsel %vm2266_vm7, %v2263_v62, %v1794_v4 }
 0x24d   : > { %v2146_v51 = vpop.permute.xlu1 %2145 }
 0x24e   : > { %v2457_v52 = vsel %vm2266_vm7, %v2406_v58, %v2146_v51  ;;  %v1666_v26 = vpop.permute.xlu0 %1665 }
 0x24f   : > { %2822 = vmatprep.mubr.bf16.mxu1 %v2457_v52  ;;  %v2228_v19 = vsel %vm2192_vm14, %v3885_v36, %v1666_v26 }
 0x250   : > { %2823 = vmatmul.mubr.bf16.gmra.mrb[56].mxu1 %v2313_v25 }
 0x251   : > { %v1967_v35 = vpop.permute.xlu1 %1966 }
 0x252   : > { %v1743_v24 = vpop.permute.xlu0 %1742  ;;  %v2374_v43 = vsel %vm2192_vm14, %v5763_v59, %v1967_v35 }
 0x253   : > { %v2265_v46 = vsel %vm2229_vm6, %v2228_v19, %v1743_v24 }
 0x255   : > { %v2148_v53 = vpop.permute.xlu1 %2147 }
 0x256   : > { %v2460_v6 = vsel %vm2266_vm7, %v2408_v30, %v2148_v53  ;;  %v1796_v0 = vpop.permute.xlu0 %1795 }
 0x257   : > { %2830 = vmatprep.mubr.bf16.mxu1 %v2460_v6  ;;  %v2319_v47 = vsel %vm2266_vm7, %v2265_v46, %v1796_v0 }
 0x258   : > { %2831 = vmatmul.mubr.bf16.gmra.mrb[60].mxu1 %v2316_v60 }
 0x259   : > { %v2020_v13 = vpop.permute.xlu1 %2019 }
 0x25a   : > { %v2410_v31 = vsel %vm2229_vm6, %v2374_v43, %v2020_v13 }
 0x25d   : > { %v2150_v44 = vpop.permute.xlu1 %2149 }
 0x25e   : > { %v2463_v42 = vsel %vm2266_vm7, %v2410_v31, %v2150_v44 }
 0x25f   : > { %2838 = vmatprep.mubr.bf16.mxu1 %v2463_v42 }
 0x260   : > { %2839 = vmatmul.mubr.bf16.gmra.mrb[64].mxu1 %v2319_v47 }
 0x267   : > { %v1034_v40 = vpop.permute.xlu0 %1033 }
 0x26e   : > { %v1031_v32 = vpop.permute.xlu1 %1030 }
 0x278   : > { %v2712_v49 = vpop.f32.mrb[0].mxu1 }
 0x279   : > { %v2714_v29 = vpop.f32.mrb[1].mxu1  ;;  %v2713_v16 = vadd.f32 %v5526_v10, %v2712_v49 }
 0x27a   : > { %v2715_v57 = vpop.f32.mrb[2].mxu1 }
 0x27b   : > { %v2717_v5 = vpop.f32.mrb[3].mxu1  ;;  %v2716_v63 = vadd.f32 %v5526_v10, %v2715_v57 }
 0x27c   : > { %v2704_v14 = vpop.f32.mrb[44].mxu0 }
 0x27d   : > { %v2706_v11 = vpop.f32.mrb[45].mxu0  ;;  %v2705_v56 = vadd.f32 %v5526_v10, %v2704_v14 }
 0x27e   : > { %v2707_v9 = vpop.f32.mrb[46].mxu0 }
 0x27f   : > { %v2709_v18 = vpop.f32.mrb[47].mxu0  ;;  %v2708_v45 = vadd.f32 %v5526_v10, %v2707_v9 }
 0x280   : > { %v2720_v27 = vpop.f32.mrb[4].mxu1 }
 0x281   : > { %v2722_v17 = vpop.f32.mrb[5].mxu1  ;;  %v2721_v54 = vadd.f32 %v5526_v10, %v2720_v27 }
 0x282   : > { %v2723_v55 = vpop.f32.mrb[6].mxu1 }
 0x283   : > { %v2725_v8 = vpop.f32.mrb[7].mxu1  ;;  %v2724_v23 = vadd.f32 %v5526_v10, %v2723_v55 }
 0x284   : > { %v3638_v38 = vpop.f32.mrb[48].mxu0 }
 0x285   : > { %v2890_v2 = vadd.f32 %v3638_v38, %v2713_v16  ;;  %v2881_v37 = vpop.f32.mrb[49].mxu0 }
 0x286   : > { %v2882_v20 = vadd.f32 %v2881_v37, %v2705_v56  ;;  %v3639_v12 = vpop.f32.mrb[50].mxu0 }
 0x287   : > { %v2893_v3 = vadd.f32 %v3639_v12, %v2716_v63  ;;  %v2884_v15 = vpop.f32.mrb[51].mxu0  ;;  %v3026_v48 = vmax.f32 %v2890_v2, 0.0 }
 0x288   : > { %v2885_v50 = vadd.f32 %v2884_v15, %v2708_v45  ;;  %v3024_v7 = vmax.f32 %v2882_v20, 0.0 }
 0x289   : > { %v3027_v28 = vmax.f32 %v2893_v3, 0.0 }
 0x28a   : > { %v3025_v22 = vmax.f32 %v2885_v50, 0.0 }
 0x28b   : > { %v5532_v39 = vpack.c.bf16 %v3027_v28, %v3026_v48 }
 0x28c   : > { %v5535_v4 = vpack.c.bf16 %v3025_v22, %v3024_v7  ;;  %v3642_v21 = vpop.f32.mrb[52].mxu0 }
 0x28d   : > { %v2897_v34 = vpop.f32.mrb[53].mxu0 }
 0x28e   : > { %v2898_v58 = vadd.f32 %v2897_v34, %v2721_v54  ;;  %v3643_v51 = vpop.f32.mrb[54].mxu0 }
 0x28f   : > { %v2900_v52 = vpop.f32.mrb[55].mxu0 }
 0x290   : > { %v2901_v25 = vadd.f32 %v2900_v52, %v2724_v23  ;;  %v2728_v26 = vpop.f32.mrb[8].mxu1  ;;  %v3028_v1 = vmax.f32 %v2898_v58, 0.0  ;;  %v3062_v58 = vlaneseq }
 0x291   : > { %v2729_v35 = vadd.f32 %v5526_v10, %v2728_v26  ;;  %v2730_v41 = vpop.f32.mrb[9].mxu1 }
 0x292   : > { %v3029_v61 = vmax.f32 %v2901_v25, 0.0  ;;  %v2731_v33 = vpop.f32.mrb[10].mxu1 }
 0x293   : > { %v2906_v30 = vadd.f32 %v3642_v21, %v2729_v35  ;;  %v2732_v53 = vadd.f32 %v5526_v10, %v2731_v33  ;;  %v2733_v24 = vpop.f32.mrb[11].mxu1 }
 0x294   : > { %v5540_v6 = vpack.c.bf16 %v3029_v61, %v3028_v1  ;;  %v3646_v62 = vpop.f32.mrb[56].mxu0  ;;  %v3063_v1 = vshrl.u32 %v3062_v58, 7  ;;  %v3060_v24 = vld [vmem:[%s5717_s6] sm:$0x7] }
 0x295   : > { %v2909_v60 = vadd.f32 %v3643_v51, %v2732_v53  ;;  %v2913_v13 = vpop.f32.mrb[57].mxu0  ;;  %v3030_v43 = vmax.f32 %v2906_v30, 0.0 }
 0x296   : > { %v3647_v59 = vpop.f32.mrb[58].mxu0 }
 0x297   : > { %v3031_v0 = vmax.f32 %v2909_v60, 0.0  ;;  %v2916_v36 = vpop.f32.mrb[59].mxu0  ;;  %v3068_v60 = vsub.s32 1, %v3063_v1 }
 0x298   : > { %v2736_v19 = vpop.f32.mrb[12].mxu1 }
 0x299   : > { %v5542_v31 = vpack.c.bf16 %v3031_v0, %v3030_v43  ;;  %v2737_v44 = vadd.f32 %v5526_v10, %v2736_v19  ;;  %v2738_v46 = vpop.f32.mrb[13].mxu1  ;;  %v3069_v0 = vrot.slane %v3060_v24, %v3068_v60 }
 0x29a   : > { %v2739_v42 = vpop.f32.mrb[14].mxu1 }
 0x29b   : > { %v2914_v47 = vadd.f32 %v2913_v13, %v2737_v44  ;;  %v2740_v40 = vadd.f32 %v5526_v10, %v2739_v42  ;;  %v2741_v32 = vpop.f32.mrb[15].mxu1  ;;  %v3072_v13 = vsub.s32 2, %v3063_v1  ;;  %3142 = vmatprep.mubr.f32.mxu0 %v3069_v0 }
 0x29c   : > { %v5546_v49 = vpop.f32.mrb[60].mxu0 }
 0x29d   : > { %v2917_v29 = vadd.f32 %v2916_v36, %v2740_v40  ;;  %v2929_v57 = vpop.f32.mrb[61].mxu0  ;;  %v3032_v14 = vmax.f32 %v2914_v47, 0.0  ;;  %v5595_v36 = vrot.slane %v3060_v24, %v3072_v13 }
 0x29e   : > { %v5548_v5 = vpop.f32.mrb[62].mxu0 }
 0x29f   : > { %v3033_v11 = vmax.f32 %v2917_v29, 0.0  ;;  %v2932_v9 = vpop.f32.mrb[63].mxu0 }
 0x2a1   : > { %v5550_v18 = vpack.c.bf16 %v3033_v11, %v3032_v14 }
 0x2a4   : > { %v5552_v27 = vpop.f32.mrb[64].mxu0 }
 0x2a5   : > { %v5554_v17 = vpop.f32.mrb[65].mxu0 }
 0x2a6   : > { %v5556_v55 = vpop.f32.mrb[66].mxu0 }
 0x2a7   : > { %v5558_v16 = vpop.f32.mrb[67].mxu0 }
 0x2ac   : > { %v5560_v8 = vpop.f32.mrb[68].mxu0 }
 0x2ad   : > { %v5562_v56 = vpop.f32.mrb[69].mxu0 }
 0x2ae   : > { %v5564_v38 = vpop.f32.mrb[70].mxu0 }
 0x2af   : > { %v5566_v63 = vpop.f32.mrb[71].mxu0 }
 0x2b4   : > { %v2744_v2 = vpop.f32.mrb[16].mxu1  ;;  %v5568_v37 = vpop.f32.mrb[72].mxu0 }
 0x2b5   : > { %v2745_v45 = vadd.f32 %v5526_v10, %v2744_v2  ;;  %v2746_v20 = vpop.f32.mrb[17].mxu1  ;;  %v5571_v12 = vpop.f32.mrb[73].mxu0 }
 0x2b6   : > { %v2747_v3 = vpop.f32.mrb[18].mxu1  ;;  %v5573_v15 = vpop.f32.mrb[74].mxu0 }
 0x2b7   : > { %v2922_v50 = vadd.f32 %v3646_v62, %v2745_v45  ;;  %v2748_v48 = vadd.f32 %v5526_v10, %v2747_v3  ;;  %v2749_v28 = vpop.f32.mrb[19].mxu1  ;;  %v5576_v7 = vpop.f32.mrb[75].mxu0  ;;  %v3064_v62 = vsub.s32 0, %v3063_v1 }
 0x2b9   : > { %v2925_v22 = vadd.f32 %v3647_v59, %v2748_v48  ;;  %v3034_v54 = vmax.f32 %v2922_v50, 0.0  ;;  %v5593_v43 = vrot.slane %v3060_v24, %v3064_v62 }
 0x2bb   : > { %v3035_v21 = vmax.f32 %v2925_v22, 0.0 }
 0x2bc   : > { %v2752_v34 = vpop.f32.mrb[20].mxu1  ;;  %v5578_v23 = vpop.f32.mrb[76].mxu0 }
 0x2bd   : > { %v5580_v51 = vpack.c.bf16 %v3035_v21, %v3034_v54  ;;  %v2753_v52 = vadd.f32 %v5526_v10, %v2752_v34  ;;  %v2754_v25 = vpop.f32.mrb[21].mxu1  ;;  %v5583_v26 = vpop.f32.mrb[77].mxu0 }
 0x2be   : > { %v2755_v35 = vpop.f32.mrb[22].mxu1  ;;  %v5585_v41 = vpop.f32.mrb[78].mxu0 }
 0x2bf   : > { %v2930_v61 = vadd.f32 %v2929_v57, %v2753_v52  ;;  %v2756_v33 = vadd.f32 %v5526_v10, %v2755_v35  ;;  %v2757_v30 = vpop.f32.mrb[23].mxu1  ;;  %v5588_v53 = vpop.f32.mrb[79].mxu0 }
 0x2c1   : > { %v2933_v59 = vadd.f32 %v2932_v9, %v2756_v33  ;;  %v3036_v19 = vmax.f32 %v2930_v61, 0.0 }
 0x2c3   : > { %v3037_v44 = vmax.f32 %v2933_v59, 0.0 }
 0x2c4   : > { %v5597_v46 = vpop.f32.mrb[80].mxu0 }
 0x2c5   : > { %v5599_v42 = vpack.c.bf16 %v3037_v44, %v3036_v19  ;;  %v5601_v47 = vpop.f32.mrb[81].mxu0 }
 0x2c6   : > { %v5603_v40 = vpop.f32.mrb[82].mxu0 }
 0x2c7   : > { %v5605_v32 = vpop.f32.mrb[83].mxu0  ;;  %v2760_v29 = vpop.f32.mrb[24].mxu1 }
 0x2c8   : > { %v2761_v57 = vadd.f32 %v5526_v10, %v2760_v29  ;;  %v2762_v14 = vpop.f32.mrb[25].mxu1 }
 0x2c9   : > { %v2763_v11 = vpop.f32.mrb[26].mxu1 }
 0x2ca   : > { %v2938_v9 = vadd.f32 %v5546_v49, %v2761_v57  ;;  %v2764_v2 = vadd.f32 %v5526_v10, %v2763_v11  ;;  %v2765_v45 = vpop.f32.mrb[27].mxu1 }
 0x2cc   : > { %v2941_v20 = vadd.f32 %v5548_v5, %v2764_v2  ;;  %v3038_v3 = vmax.f32 %v2938_v9, 0.0 }
 0x2ce   : > { %v3039_v50 = vmax.f32 %v2941_v20, 0.0 }
 0x2cf   : > { %v2768_v48 = vpop.f32.mrb[28].mxu1 }
 0x2d0   : > { %v5611_v28 = vpack.c.bf16 %v3039_v50, %v3038_v3  ;;  %v2769_v22 = vadd.f32 %v5526_v10, %v2768_v48  ;;  %v2770_v54 = vpop.f32.mrb[29].mxu1 }
 0x2d1   : > { %v2771_v21 = vpop.f32.mrb[30].mxu1 }
 0x2d2   : > { %v2946_v34 = vadd.f32 %v5554_v17, %v2769_v22  ;;  %v2772_v58 = vadd.f32 %v5526_v10, %v2771_v21  ;;  %v2773_v52 = vpop.f32.mrb[31].mxu1 }
 0x2d4   : > { %v2949_v49 = vadd.f32 %v5558_v16, %v2772_v58  ;;  %v3040_v25 = vmax.f32 %v2946_v34, 0.0 }
 0x2d6   : > { %v3041_v35 = vmax.f32 %v2949_v49, 0.0 }
 0x2d8   : > { %v3683_v1 = vpack.c.bf16 %v3041_v35, %v3040_v25 }
 0x2da   : > { %3684 = vmatprep.subr.bf16.mxu0 %v3683_v1 }
 0x2db   : > { %3686 = vmatpush3.bf16.msra.mxu0 %v5535_v4 }
 0x2df   : > { %v2776_v5 = vpop.f32.mrb[32].mxu1 }
 0x2e0   : > { %v2777_v61 = vadd.f32 %v5526_v10, %v2776_v5  ;;  %v2778_v33 = vpop.f32.mrb[33].mxu1 }
 0x2e1   : > { %v2779_v30 = vpop.f32.mrb[34].mxu1 }
 0x2e2   : > { %v2954_v24 = vadd.f32 %v5552_v27, %v2777_v61  ;;  %v2780_v17 = vadd.f32 %v5526_v10, %v2779_v30  ;;  %v2781_v62 = vpop.f32.mrb[35].mxu1 }
 0x2e4   : > { %v2957_v60 = vadd.f32 %v5556_v55, %v2780_v17  ;;  %v3042_v13 = vmax.f32 %v2954_v24, 0.0 }
 0x2e6   : > { %v3043_v16 = vmax.f32 %v2957_v60, 0.0 }
 0x2e7   : > { %v2784_v59 = vpop.f32.mrb[36].mxu1 }
 0x2e8   : > { %v2785_v0 = vadd.f32 %v5526_v10, %v2784_v59  ;;  %v2786_v19 = vpop.f32.mrb[37].mxu1  ;;  %v3687_v44 = vpack.c.bf16 %v3043_v16, %v3042_v13 }
 0x2e9   : > { %v2787_v4 = vpop.f32.mrb[38].mxu1 }
 0x2ea   : > { %v2962_v29 = vadd.f32 %v5562_v56, %v2785_v0  ;;  %v2788_v57 = vadd.f32 %v5526_v10, %v2787_v4  ;;  %v2789_v14 = vpop.f32.mrb[39].mxu1  ;;  %3688 = vmatprep.subr.bf16.mxu0 %v3687_v44 }
 0x2eb   : > { %3690 = vmatpush3.bf16.msra.mxu0 %v5532_v39 }
 0x2ec   : > { %v2965_v27 = vadd.f32 %v5566_v63, %v2788_v57  ;;  %v3044_v11 = vmax.f32 %v2962_v29, 0.0 }
 0x2ee   : > { %v3045_v55 = vmax.f32 %v2965_v27, 0.0 }
 0x2f0   : > { %v3691_v9 = vpack.c.bf16 %v3045_v55, %v3044_v11 }
 0x2f2   : > { %3692 = vmatprep.subr.bf16.mxu0 %v3691_v9 }
 0x2f3   : > { %3694 = vmatpush3.bf16.msra.mxu0 %v5540_v6 }
 0x2f7   : > { %v2792_v2 = vpop.f32.mrb[40].mxu1 }
 0x2f8   : > { %v2793_v45 = vadd.f32 %v5526_v10, %v2792_v2  ;;  %v2794_v20 = vpop.f32.mrb[41].mxu1 }
 0x2f9   : > { %v2795_v3 = vpop.f32.mrb[42].mxu1 }
 0x2fa   : > { %v2970_v56 = vadd.f32 %v5560_v8, %v2793_v45  ;;  %v2796_v50 = vadd.f32 %v5526_v10, %v2795_v3  ;;  %v2797_v48 = vpop.f32.mrb[43].mxu1 }
 0x2fc   : > { %v2973_v39 = vadd.f32 %v5564_v38, %v2796_v50  ;;  %v3046_v22 = vmax.f32 %v2970_v56, 0.0 }
 0x2fe   : > { %v3047_v63 = vmax.f32 %v2973_v39, 0.0 }
 0x2ff   : > { %v2800_v54 = vpop.f32.mrb[44].mxu1 }
 0x300   : > { %v2801_v21 = vadd.f32 %v5526_v10, %v2800_v54  ;;  %v2802_v34 = vpop.f32.mrb[45].mxu1  ;;  %v3695_v58 = vpack.c.bf16 %v3047_v63, %v3046_v22  ;;  %v3955_v22 = vmov 0.0|0.0  }
 0x301   : > { %v2803_v6 = vpop.f32.mrb[46].mxu1 }
 0x302   : > { %v2978_v52 = vadd.f32 %v5571_v12, %v2801_v21  ;;  %v2804_v49 = vadd.f32 %v5526_v10, %v2803_v6  ;;  %v2805_v25 = vpop.f32.mrb[47].mxu1  ;;  %3696 = vmatprep.subr.bf16.mxu0 %v3695_v58  ;;  %v3957_v21 = vmov 0.0  }
 0x303   : > { %3698 = vmatpush3.bf16.msra.mxu0 %v5542_v31 }
 0x304   : > { %v2981_v8 = vadd.f32 %v5576_v7, %v2804_v49  ;;  %v3048_v35 = vmax.f32 %v2978_v52, 0.0 }
 0x306   : > { %v3049_v38 = vmax.f32 %v2981_v8, 0.0 }
 0x308   : > { %v3699_v1 = vpack.c.bf16 %v3049_v38, %v3048_v35 }
 0x30a   : > { %3700 = vmatprep.subr.bf16.mxu0 %v3699_v1 }
 0x30b   : > { %3702 = vmatpush3.bf16.msra.mxu0 %v5550_v18 }
 0x30f   : > { %v2808_v5 = vpop.f32.mrb[48].mxu1 }
 0x310   : > { %v2809_v61 = vadd.f32 %v5526_v10, %v2808_v5  ;;  %v2810_v33 = vpop.f32.mrb[49].mxu1 }
 0x311   : > { %v2811_v30 = vpop.f32.mrb[50].mxu1 }
 0x312   : > { %v2986_v12 = vadd.f32 %v5568_v37, %v2809_v61  ;;  %v2812_v24 = vadd.f32 %v5526_v10, %v2811_v30  ;;  %v2813_v17 = vpop.f32.mrb[51].mxu1 }
 0x314   : > { %v2989_v31 = vadd.f32 %v5573_v15, %v2812_v24  ;;  %v3050_v62 = vmax.f32 %v2986_v12, 0.0 }
 0x316   : > { %v3051_v7 = vmax.f32 %v2989_v31, 0.0 }
 0x317   : > { %v2816_v60 = vpop.f32.mrb[52].mxu1 }
 0x318   : > { %v2817_v13 = vadd.f32 %v5526_v10, %v2816_v60  ;;  %v2818_v16 = vpop.f32.mrb[53].mxu1  ;;  %v3703_v59 = vpack.c.bf16 %v3051_v7, %v3050_v62 }
 0x319   : > { %v2819_v18 = vpop.f32.mrb[54].mxu1 }
 0x31a   : > { %v2994_v0 = vadd.f32 %v5583_v26, %v2817_v13  ;;  %v2820_v19 = vadd.f32 %v5526_v10, %v2819_v18  ;;  %v2821_v44 = vpop.f32.mrb[55].mxu1  ;;  %3704 = vmatprep.subr.bf16.mxu0 %v3703_v59 }
 0x31b   : > { %3706 = vmatpush3.bf16.msra.mxu0 %v5580_v51 }
 0x31c   : > { %v2997_v37 = vadd.f32 %v5588_v53, %v2820_v19  ;;  %v3052_v4 = vmax.f32 %v2994_v0, 0.0 }
 0x31e   : > { %v3053_v15 = vmax.f32 %v2997_v37, 0.0 }
 0x320   : > { %v3707_v29 = vpack.c.bf16 %v3053_v15, %v3052_v4 }
 0x322   : > { %3708 = vmatprep.subr.bf16.mxu0 %v3707_v29 }
 0x323   : > { %v2824_v57 = vpop.f32.mrb[56].mxu1  ;;  %3710 = vmatpush3.bf16.msra.mxu0 %v5599_v42 }
 0x324   : > { %v2825_v14 = vadd.f32 %v5526_v10, %v2824_v57  ;;  %v2826_v27 = vpop.f32.mrb[57].mxu1 }
 0x325   : > { %v2827_v11 = vpop.f32.mrb[58].mxu1 }
 0x326   : > { %v3002_v26 = vadd.f32 %v5578_v23, %v2825_v14  ;;  %v2828_v55 = vadd.f32 %v5526_v10, %v2827_v11  ;;  %v2829_v9 = vpop.f32.mrb[59].mxu1 }
 0x328   : > { %v3005_v51 = vadd.f32 %v5585_v41, %v2828_v55  ;;  %v3054_v2 = vmax.f32 %v3002_v26, 0.0 }
 0x32a   : > { %v3055_v53 = vmax.f32 %v3005_v51, 0.0 }
 0x32b   : > { %v2832_v45 = vpop.f32.mrb[60].mxu1 }
 0x32c   : > { %v2833_v20 = vadd.f32 %v5526_v10, %v2832_v45  ;;  %v2834_v3 = vpop.f32.mrb[61].mxu1  ;;  %v3711_v56 = vpack.c.bf16 %v3055_v53, %v3054_v2 }
 0x32d   : > { %v2835_v50 = vpop.f32.mrb[62].mxu1 }
 0x32e   : > { %v3010_v42 = vadd.f32 %v5601_v47, %v2833_v20  ;;  %v2836_v48 = vadd.f32 %v5526_v10, %v2835_v50  ;;  %v2837_v39 = vpop.f32.mrb[63].mxu1  ;;  %3712 = vmatprep.subr.bf16.mxu0 %v3711_v56 }
 0x32f   : > { %3714 = vmatpush3.bf16.msra.mxu0 %v5611_v28 }
 0x330   : > { %v3013_v23 = vadd.f32 %v5605_v32, %v2836_v48  ;;  %3715 = vmatprep.subr.bf16.mxu0 %v3955_v22  ;;  %v3056_v41 = vmax.f32 %v3010_v42, 0.0 }
 0x332   : > { %v3057_v63 = vmax.f32 %v3013_v23, 0.0  ;;  %3143 = vmatmul.mubr.f32.vlgmr.msra.gmra.mrb[84].mxu0 %v5593_v43 }
 0x333   : > { %v2840_v54 = vpop.f32.mrb[64].mxu1  ;;  %3680 = vmatprep.mubr.msk.f32.mxu0 %vm3956_vm12, %v3957_v21 }
 0x334   : > { %v3716_v34 = vpack.c.bf16 %v3057_v63, %v3056_v41  ;;  %v2841_v47 = vadd.f32 %v5526_v10, %v2840_v54  ;;  %v2842_v58 = vpop.f32.mrb[65].mxu1 }
 0x335   : > { %v2843_v6 = vpop.f32.mrb[66].mxu1 }
 0x336   : > { %v3018_v28 = vadd.f32 %v5597_v46, %v2841_v47  ;;  %v2844_v32 = vadd.f32 %v5526_v10, %v2843_v6  ;;  %v2845_v52 = vpop.f32.mrb[67].mxu1  ;;  %3717 = vmatpush3.bf16.msra.mxu0 %v3716_v34 }
 0x337   : > { %3718 = vmatprep.subr.bf16.mxu0 %v3955_v22 }
 0x338   : > { %v3021_v43 = vadd.f32 %v5603_v40, %v2844_v32  ;;  %v3058_v49 = vmax.f32 %v3018_v28, 0.0 }
 0x33a   : > { %v3059_v25 = vmax.f32 %v3021_v43, 0.0 }
 0x33c   : > { %v3719_v8 = vpack.c.bf16 %v3059_v25, %v3058_v49 }
 0x33e   : > { %3720 = vmatpush3.bf16.msra.mxu0 %v3719_v8 }
 0x341   : > { %3681 = vmatmul.mubr.msk.f32.vlgmr.msra.gmra.mrb[86].mxu0 %vm2192_vm14, %v5595_v36 }
 0x405   : > { %v3574_v35 = vpop.f32.mrb[84].mxu0 }
 0x406   : > { %v3575_v38 = vpop.f32.mrb[85].mxu0 }
 0x407   : > { %v3576_v1 = vadd.f32 %v3575_v38, %v3574_v35 }
 0x414   : > { %v3214_v10 = vpop.f32.mrb[86].mxu0 }
 0x415   : > { %v3215_v46 = vadd.f32 %v3576_v1, %v3214_v10  ;;  %v3682_v5 = vpop.f32.mrb[87].mxu0 }
 0x417   : > { %3218 = vst [vmem:[%s270_s29] sm:$0x1] %v3215_v46 }
 0x418   : > { %3900 = shalt.err (!%p3897_p3)
}
 0x419   : > { %s3901_s16 = scalar_lea.hbm %s5669_s15, 16  ;;  %s3905_s21 = scalar_lea.hbm %s5718_s7, 32 }
 0x41a   : > { %p3902_p4 = scmp.ne.s32.totalorder %s5669_s15, %s3901_s16  ;;  %p3906_p9 = scmp.lt.u32.totalorder %s5669_s15, %s5718_s7 }
 0x41b   : > { %p3907_p10 = scmp.lt.u32.totalorder %s3905_s21, %s3901_s16  ;;  %p3909_p12 = scmp.lt.u32.totalorder %s3901_s16, %s5669_s15 }
 0x41c   : > { %p3903_p7 = pnand %p3902_p4, %p4037_p5 }
 0x41d   : > { %p3908_p11 = por %p3907_p10, %p3906_p9 }
 0x41e   : > { %p3904_p8 = pneg %p3903_p7 }
 0x41f   : > { %p3910_p13 = por %p3909_p12, %p3908_p11 }
 0x421   : > { %p3911_p0 = pnand %p3910_p13, %p3904_p8 }
 0x423   : > { %3914 = shalt.err (!%p3911_p0)
}
 0x424   : > { %3755 = dma.vmem_to_hbm [thread:$0]  (%p4037_p5), %s5671_s13, 16, %s5669_s15, %s3220_s17  }
 0x425 PF: > { %p3761_p1 = scmp.ge.s32.totalorder %s3949_s27, 2  ;;  %s3244_s9 = sand.u32 1, %s3937_s24  }
 0x426   : > { %s3245_s14 = scalar_lea.sflag [#allocation4], %s3244_s9 }
 0x427   : > { %p3758_p2 = pnand %p3761_p1, %p4041_p6 }
 0x429   : > { %3932 = dma.done.wait (!%p3758_p2), %s3245_s14, 16  }
 0x42a   : > { %3934 = vsyncadd (!%p3758_p2), %s3245_s14, 4294967280  ;;  %p17_p3 = scmp.ge.s32.totalorder %s4024_s30, 4   ;;  %s5764_s24 = smov %s3941_s25 }
 0x42b   : > { %s5765_s25 = smov %s3945_s26  ;;  %s5766_s26 = smov %s4035_s10 }
 0x42c   : > { %s5767_s27 = smov %s4024_s30  ;;  %19 = sbr.rel (!%p17_p3) target bundleno = 3 (0x3), region = 83 }
 0x433   :  { %3249 = vsyncpa [#allocation4], 1 }
 0x434   :  { %3251 = vsyncpa [#allocation4 + $0x1], 1 }

</bundles_post_ra>
